<compile_context>
chip_gen: v5e
topology: v5e:2x2
jax: 0.10.0
libtpu: 0.0.40
codegen_flags: <defaults>
</compile_context>

<pallas_src>
import jax
import jax.numpy as jnp
from jax.experimental import pallas as pl
from jax.experimental.pallas import tpu as pltpu


def _round_up(n, m):
    return ((n + m - 1) // m) * m


def mnist_linear_kernel(x_ref, w1_ref, b1_ref, w2_ref, b2_ref, o_ref):
    # x_ref : (TB, IN_PAD)   bf16    w1_ref: (IN_PAD, HID)  bf16   b1_ref: (1, HID)     f32
    # w2_ref: (HID, OUT_PAD) bf16    b2_ref: (1, OUT_PAD)   f32 (padded cols = -1e30)
    # o_ref : (TB, OUT_PAD)  f32
    # Layer 1: bf16 MXU matmul, f32 accumulate; bias + ReLU on the VPU in f32.
    h = jnp.dot(x_ref[...], w1_ref[...], preferred_element_type=jnp.float32)
    h = jnp.maximum(h + b1_ref[...], 0.0)

    # Layer 2: bf16 MXU matmul, f32 accumulate. The -1e30 bias on the padded
    # columns makes them vanish (exp -> 0) in the softmax below.
    logits = jnp.dot(h.astype(jnp.bfloat16), w2_ref[...],
                     preferred_element_type=jnp.float32) + b2_ref[...]

    # Numerically stable softmax over the lane-dense (128-wide) class axis.
    m = jnp.max(logits, axis=-1, keepdims=True)
    e = jnp.exp(logits - m)
    denom = jnp.sum(e, axis=-1, keepdims=True)
    # Reciprocal on the EUP slot (exact), multiply on the VPU.
    o_ref[...] = e * pl.reciprocal(denom, approx=False)


def mnist_linear_forward(x, w1, b1, w2, b2, *, tile_b=None):
    """softmax(relu(x @ w1 + b1) @ w2 + b2) with x:(B,IN), w1:(IN,HID), w2:(HID,OUT)."""
    B, IN = x.shape
    HID = w1.shape[1]
    OUT = w2.shape[1]

    IN_PAD = _round_up(IN, 128)    # 784 -> 896: aligned K tiles for the MXU
    OUT_PAD = _round_up(OUT, 128)  # 10  -> 128: lane-dense output stores

    # Batch tile: >=128 rows when possible, otherwise the whole (small) batch
    # in one grid step. VMEM budget per step (bf16 x tile, double-buffered,
    # plus resident W1/W2) stays far below v5e's 16 MiB scoped default.
    if tile_b is None:
        if B % 256 == 0 and B > 256:
            tile_b = 256
        elif B % 128 == 0 and B > 128:
            tile_b = 128
        else:
            tile_b = B
    assert B % tile_b == 0, "batch must be divisible by tile_b"
    grid = (B // tile_b,)

    # bf16 matmul operands (accumulation is f32 inside the kernel); f32 biases.
    x_p = jnp.zeros((B, IN_PAD), jnp.bfloat16).at[:, :IN].set(x.astype(jnp.bfloat16))
    w1_p = jnp.zeros((IN_PAD, HID), jnp.bfloat16).at[:IN, :].set(w1.astype(jnp.bfloat16))
    b1_p = jnp.reshape(b1, (1, HID)).astype(jnp.float32)
    w2_p = jnp.zeros((HID, OUT_PAD), jnp.bfloat16).at[:, :OUT].set(w2.astype(jnp.bfloat16))
    # Padded logit columns get a huge negative bias -> exp()=0 -> softmax ignores them.
    b2_p = jnp.full((1, OUT_PAD), -1e30, jnp.float32).at[:, :OUT].set(
        jnp.reshape(b2, (1, OUT)).astype(jnp.float32))

    cost = pl.CostEstimate(
        flops=2 * B * (IN_PAD * HID + HID * OUT_PAD),
        transcendentals=B * OUT_PAD,
        bytes_accessed=(x_p.size * 2 + w1_p.size * 2 + w2_p.size * 2
                        + b1_p.size * 4 + b2_p.size * 4 + B * OUT_PAD * 4),
    )

    out = pl.pallas_call(
        mnist_linear_kernel,
        out_shape=jax.ShapeDtypeStruct((B, OUT_PAD), jnp.float32),
        grid_spec=pltpu.PrefetchScalarGridSpec(
            num_scalar_prefetch=0,
            grid=grid,
            in_specs=[
                pl.BlockSpec((tile_b, IN_PAD), lambda i: (i, 0)),   # x: batch-tiled
                pl.BlockSpec((IN_PAD, HID), lambda i: (0, 0)),      # W1: resident
                pl.BlockSpec((1, HID), lambda i: (0, 0)),           # b1: resident
                pl.BlockSpec((HID, OUT_PAD), lambda i: (0, 0)),     # W2: resident
                pl.BlockSpec((1, OUT_PAD), lambda i: (0, 0)),       # b2: resident
            ],
            out_specs=pl.BlockSpec((tile_b, OUT_PAD), lambda i: (i, 0)),
        ),
        compiler_params=pltpu.CompilerParams(
            dimension_semantics=("parallel",),   # megacore / v7x 2-TC sharding
        ),
        cost_estimate=cost,
    )(x_p, w1_p, b1_p, w2_p, b2_p)

    return out[:, :OUT]


if __name__ == "__main__":
    INPUT_SIZE, HIDDEN_SIZE, OUTPUT_SIZE = 784, 256, 10
    BATCH = 256  # two 128-row tiles -> even, length-2 parallel grid

    key = jax.random.PRNGKey(0)
    kx, kw1, kb1, kw2, kb2 = jax.random.split(key, 5)

    # Deterministic init mimicking nn.Linear's U(-1/sqrt(fan_in), 1/sqrt(fan_in)).
    lim1 = 1.0 / jnp.sqrt(float(INPUT_SIZE))
    lim2 = 1.0 / jnp.sqrt(float(HIDDEN_SIZE))
    w1 = jax.random.uniform(kw1, (INPUT_SIZE, HIDDEN_SIZE), jnp.float32, -lim1, lim1)
    b1 = jax.random.uniform(kb1, (1, HIDDEN_SIZE), jnp.float32, -lim1, lim1)
    w2 = jax.random.uniform(kw2, (HIDDEN_SIZE, OUTPUT_SIZE), jnp.float32, -lim2, lim2)
    b2 = jax.random.uniform(kb2, (1, OUTPUT_SIZE), jnp.float32, -lim2, lim2)
    x = jax.random.normal(kx, (BATCH, INPUT_SIZE), jnp.float32)

    out = mnist_linear_forward(x, w1, b1, w2, b2, tile_b=128)
    out = jax.block_until_ready(out)
    assert out.shape == (BATCH, OUTPUT_SIZE)

    # Reference 1: identical bf16-matmul / f32-accumulate math in plain JAX.
    xb, w1b, w2b = (a.astype(jnp.bfloat16) for a in (x, w1, w2))
    h_ref = jnp.maximum(jnp.dot(xb, w1b, preferred_element_type=jnp.float32) + b1, 0.0)
    logits_ref = jnp.dot(h_ref.astype(jnp.bfloat16), w2b,
                         preferred_element_type=jnp.float32) + b2
    ref_bf16 = jax.nn.softmax(logits_ref, axis=-1)
    assert jnp.allclose(out, ref_bf16, atol=1e-4, rtol=1e-4), \
        float(jnp.max(jnp.abs(out - ref_bf16)))

    # Reference 2: full-f32 math (same as the PyTorch forward); loose tolerance
    # only accounts for the bf16 matmul operands.
    h32 = jnp.maximum(x @ w1 + b1, 0.0)
    ref_f32 = jax.nn.softmax(h32 @ w2 + b2, axis=-1)
    assert jnp.allclose(out, ref_f32, atol=3e-2), \
        float(jnp.max(jnp.abs(out - ref_f32)))

    # Softmax rows must sum to 1 (padded classes contribute exactly 0).
    assert jnp.allclose(jnp.sum(out, axis=-1), 1.0, atol=1e-5)

    print("KERNEL_OK")
</pallas_src>

<mosaic_0001>
module attributes {stable_mosaic.version = 11 : i64} {
  func.func @mnist_linear_kernel(%arg0: i32, %arg1: memref<128x896xbf16, #tpu.memory_space<vmem>>, %arg2: memref<896x256xbf16, #tpu.memory_space<vmem>>, %arg3: memref<1x256xf32, #tpu.memory_space<vmem>>, %arg4: memref<256x128xbf16, #tpu.memory_space<vmem>>, %arg5: memref<1x128xf32, #tpu.memory_space<vmem>>, %arg6: memref<128x128xf32, #tpu.memory_space<vmem>>) attributes {dimension_semantics = [#tpu.dimension_semantics<parallel>], iteration_bounds = array<i64: 2>, scalar_prefetch = 0 : i64, scratch_operands = 0 : i64, tpu.core_type = #tpu.core_type<tc>, window_params = [{transform_indices = @transform_0, window_bounds = array<i64: 128, 896>}, {pipeline_mode = #tpu.pipeline_mode<synchronous>, transform_indices = @transform_1, window_bounds = array<i64: 896, 256>}, {pipeline_mode = #tpu.pipeline_mode<synchronous>, transform_indices = @transform_2, window_bounds = array<i64: 1, 256>}, {pipeline_mode = #tpu.pipeline_mode<synchronous>, transform_indices = @transform_3, window_bounds = array<i64: 256, 128>}, {pipeline_mode = #tpu.pipeline_mode<synchronous>, transform_indices = @transform_4, window_bounds = array<i64: 1, 128>}, {transform_indices = @transform_5, window_bounds = array<i64: 128, 128>}]} {
    %c0 = arith.constant 0 : index
    %c0_0 = arith.constant 0 : index
    %0 = vector.load %arg1[%c0, %c0_0] : memref<128x896xbf16, #tpu.memory_space<vmem>>, vector<128x896xbf16>
    %c0_1 = arith.constant 0 : index
    %c0_2 = arith.constant 0 : index
    %1 = vector.load %arg2[%c0_1, %c0_2] : memref<896x256xbf16, #tpu.memory_space<vmem>>, vector<896x256xbf16>
    %cst = arith.constant dense<0.000000e+00> : vector<128x256xf32>
    %2 = tpu.matmul %0, %1, %cst {dimension_numbers = #tpu.dot_dimension_numbers<[1], [0], [0], [1], [0, 0, 1, 1], [], []>} : vector<128x896xbf16>, vector<896x256xbf16>, vector<128x256xf32> -> vector<128x256xf32>
    %c0_3 = arith.constant 0 : index
    %c0_4 = arith.constant 0 : index
    %3 = vector.load %arg3[%c0_3, %c0_4] : memref<1x256xf32, #tpu.memory_space<vmem>>, vector<1x256xf32>
    %4 = vector.broadcast %3 : vector<1x256xf32> to vector<128x256xf32>
    %5 = arith.addf %2, %4 : vector<128x256xf32>
    %cst_5 = arith.constant 0.000000e+00 : f32
    %6 = vector.broadcast %cst_5 : f32 to vector<128x256xf32>
    %7 = arith.maximumf %5, %6 : vector<128x256xf32>
    %8 = arith.truncf %7 : vector<128x256xf32> to vector<128x256xbf16>
    %c0_6 = arith.constant 0 : index
    %c0_7 = arith.constant 0 : index
    %9 = vector.load %arg4[%c0_6, %c0_7] : memref<256x128xbf16, #tpu.memory_space<vmem>>, vector<256x128xbf16>
    %cst_8 = arith.constant dense<0.000000e+00> : vector<128x128xf32>
    %10 = tpu.matmul %8, %9, %cst_8 {dimension_numbers = #tpu.dot_dimension_numbers<[1], [0], [0], [1], [0, 0, 1, 1], [], []>} : vector<128x256xbf16>, vector<256x128xbf16>, vector<128x128xf32> -> vector<128x128xf32>
    %c0_9 = arith.constant 0 : index
    %c0_10 = arith.constant 0 : index
    %11 = vector.load %arg5[%c0_9, %c0_10] : memref<1x128xf32, #tpu.memory_space<vmem>>, vector<1x128xf32>
    %12 = vector.broadcast %11 : vector<1x128xf32> to vector<128x128xf32>
    %13 = arith.addf %10, %12 : vector<128x128xf32>
    %cst_11 = arith.constant dense<0xFF800000> : vector<128xf32>
    %14 = vector.multi_reduction <maximumf>, %13, %cst_11 [1] : vector<128x128xf32> to vector<128xf32>
    %15 = vector.shape_cast %14 : vector<128xf32> to vector<128x1xf32>
    %16 = vector.broadcast %15 : vector<128x1xf32> to vector<128x128xf32>
    %17 = arith.subf %13, %16 : vector<128x128xf32>
    %18 = math.exp %17 : vector<128x128xf32>
    %cst_12 = arith.constant dense<0.000000e+00> : vector<128xf32>
    %19 = vector.multi_reduction <add>, %18, %cst_12 [1] : vector<128x128xf32> to vector<128xf32>
    %20 = vector.shape_cast %19 : vector<128xf32> to vector<128x1xf32>
    %21 = tpu.reciprocal %20 : vector<128x1xf32> -> vector<128x1xf32>
    %22 = vector.broadcast %21 : vector<128x1xf32> to vector<128x128xf32>
    %23 = arith.mulf %18, %22 : vector<128x128xf32>
    %c0_13 = arith.constant 0 : index
    %c0_14 = arith.constant 0 : index
    %24 = vector.load %arg6[%c0_13, %c0_14] : memref<128x128xf32, #tpu.memory_space<vmem>>, vector<128x128xf32>
    tpu.vector_store %arg6[%c0_13, %c0_14], %23 {strides = array<i32>} : memref<128x128xf32, #tpu.memory_space<vmem>>, vector<128x128xf32>,
    return
  }
  func.func @transform_0(%arg0: i32) -> (i32, i32) {
    %c0_i32 = arith.constant 0 : i32
    %c0_i32_0 = arith.constant 0 : i32
    return %arg0, %c0_i32 : i32, i32
  }
  func.func @transform_1(%arg0: i32) -> (i32, i32) {
    %c0_i32 = arith.constant 0 : i32
    %c0_i32_0 = arith.constant 0 : i32
    %c0_i32_1 = arith.constant 0 : i32
    return %c0_i32, %c0_i32_0 : i32, i32
  }
  func.func @transform_2(%arg0: i32) -> (i32, i32) {
    %c0_i32 = arith.constant 0 : i32
    %c0_i32_0 = arith.constant 0 : i32
    %c0_i32_1 = arith.constant 0 : i32
    return %c0_i32, %c0_i32_0 : i32, i32
  }
  func.func @transform_3(%arg0: i32) -> (i32, i32) {
    %c0_i32 = arith.constant 0 : i32
    %c0_i32_0 = arith.constant 0 : i32
    %c0_i32_1 = arith.constant 0 : i32
    return %c0_i32, %c0_i32_0 : i32, i32
  }
  func.func @transform_4(%arg0: i32) -> (i32, i32) {
    %c0_i32 = arith.constant 0 : i32
    %c0_i32_0 = arith.constant 0 : i32
    %c0_i32_1 = arith.constant 0 : i32
    return %c0_i32, %c0_i32_0 : i32, i32
  }
  func.func @transform_5(%arg0: i32) -> (i32, i32) {
    %c0_i32 = arith.constant 0 : i32
    %c0_i32_0 = arith.constant 0 : i32
    return %arg0, %c0_i32 : i32, i32
  }
}

</mosaic_0001>

<bundles_post_ra>
// kernel: tpu_custom_call.1
= control target key start
LH: loop header
LB: loop body
LE: loop exit
PB: predicated region body
PF: predicated region fallthrough
CT: control target
= control target key end

     0   :  { %s4952_s0 = inlined_call_operand.hbm [shape: bf16[256,896], index: 0, kind: input, shape index: {}]   ;;  %s4953_s1 = inlined_call_operand.hbm [shape: bf16[896,256], index: 1, kind: input, shape index: {}]   ;;  %s4954_s2 = inlined_call_operand.hbm [shape: f32[1,256], index: 2, kind: input, shape index: {}]   ;;  %s4955_s3 = inlined_call_operand.hbm [shape: bf16[256,128], index: 3, kind: input, shape index: {}]   ;;  %s4956_s4 = inlined_call_operand.vmem [shape: f32[1,128], index: 4, kind: input, shape index: {}]   ;;  %s4957_s5 = inlined_call_operand.hbm [shape: f32[256,128], index: 5, kind: output, shape index: {}]  }
   0x1   :  { %4976 = sst [smem:[#allocation33_spill]] %s4953_s1 }
   0x2   :  { %10 = vsyncpa [#allocation3], 0 }
   0x3   :  { %12 = vsyncpa [#allocation3 + $0x1], 0 }
   0x4   :  { %13 = vsyncpa [#allocation6], 0 }
   0x5   :  { %14 = vsyncpa [#allocation9], 0 }
   0x6   :  { %15 = vsyncpa [#allocation4], 0 }
   0x7   :  { %17 = vsyncpa [#allocation4 + $0x1], 0  ;;  %s4107_s18 = smov 0   ;;  %s4109_s19 = smov 0  }
   0x8   :  { %s4111_s20 = smov 0   ;;  %s4113_s21 = smov 0  }
   0x9 LB: > { %s4128_s22 = sadd.s32 4294967295, %s4064_s21   ;;  %s2776_s23 = sadd.s32 4294967294, %s4064_s21   ;;  %s4064_s21 = sphi %s4113_s21, %s5024_s21   ;;  %s4060_s20 = sphi %s4111_s20, %s5023_s20   ;;  %s4056_s19 = sphi %s4109_s19, %s5022_s19   ;;  %s4052_s18 = sphi %s4107_s18, %s5021_s18  }
   0xa   : > { %p43_p0 = scmp.ne.s32.totalorder %s4056_s19, %s4052_s18  ;;  %p44_p1 = scmp.eq.s32.totalorder %s4128_s22, 0 }
   0xb   : > { %p151_p2 = scmp.eq.s32.totalorder %s4128_s22, 1  ;;  %p157_p3 = scmp.eq.s32.totalorder %s2776_s23, 1 }
   0xc   : > { %p4137_p4 = por %p44_p1, %p43_p0  ;;  %p2777_p5 = scmp.ge.s32.totalorder %s4064_s21, 1 }
   0xd   : > { %p4142_p6 = por %p157_p3, %p43_p0  ;;  %p164_p7 = scmp.lt.s32.totalorder %s4064_s21, 3 }
   0xe   : > { %s4979_s1 = sld [smem:[#allocation33_spill]]  ;;  %s4066_s30 = smov [#allocation5]  }
   0xf   : > { %p4150_p8 = pnand %p2777_p5, %p164_p7  ;;  %s177_s6 = sshll.u32 %s4066_s30, 4  ;;  %s178_s6 = int_to_ptr.vmem [resolvable:$true] %s177_s6 }
  0x10   : > { %s190_s10 = sshll.u32 %s4954_s2, 4  ;;  %s4067_s11 = smov 128   ;;  %s191_s10 = int_to_ptr.hbm [resolvable:$true] %s190_s10 }
  0x11   : > { %p3735_p9 = pneg %p4150_p8  ;;  %s4068_s12 = smov 8  }
  0x12   : > { %s4069_s13 = smov [#allocation7]   ;;  %s201_s17 = sshll.u32 %s4955_s3, 4  ;;  %s202_s17 = int_to_ptr.hbm [resolvable:$true] %s201_s17 }
  0x13   : > { %p4158_p10 = pnand %p3735_p9, %p44_p1  ;;  %s192_s14 = sshll.u32 %s4069_s13, 4  ;;  %s193_s14 = int_to_ptr.vmem [resolvable:$true] %s192_s14 }
  0x14   : > { %s175_s28 = sshll.u32 %s4979_s1, 4  ;;  %s4070_s23 = smov [#allocation8]   ;;  %s176_s28 = int_to_ptr.hbm [resolvable:$true] %s175_s28 }
  0x15   : > { %3738 = dma.hbm_to_vmem [thread:$0]  (!%p4158_p10), %s176_s28, 14336, %s178_s6, [#allocation6], %s4067_s11, %s4067_s11, %s4068_s12  }
  0x16   : > { %3741 = dma.hbm_to_vmem [thread:$0]  (!%p4158_p10), %s191_s10, 32, %s193_s14, [#allocation6]  }
  0x17   : > { %s203_s26 = sshll.u32 %s4070_s23, 4  ;;  %s4071_s27 = smov 64   ;;  %s204_s26 = int_to_ptr.vmem [resolvable:$true] %s203_s26 }
  0x18   : > { %s4072_s28 = smov 4   ;;  %s4176_s30 = sadd.s32 1, %s4064_s21  }
  0x19   : > { %3744 = dma.hbm_to_vmem [thread:$0]  (!%p4158_p10), %s202_s17, 2048, %s204_s26, [#allocation9], %s4071_s27, %s4071_s27, %s4072_s28  }
  0x1a   : > { %s27_s6 = ssub.s32 %s4064_s21, %s4176_s30  ;;  %s30_s8 = sadd.s32 1, %s4060_s20 }
  0x1b   : > { %p28_p12 = scmp.eq.s32.totalorder %s27_s6, 0  ;;  %p37_p13 = scmp.ne.s32.totalorder %s4060_s20, %s4056_s19 }
  0x1c   : > { %p38_p0 = scmp.eq.s32.totalorder %s4064_s21, 0  ;;  %p3756_p3 = scmp.lt.s32.totalorder %s4064_s21, 2 }
  0x1d   : > { %s4186_s9 = scalar_select %p28_p12, %s4060_s20, %s30_s8  }
  0x1e   : > { %p39_p5 = por %p38_p0, %p37_p13  ;;  %p4190_p7 = por %p151_p2, %p37_p13 }
  0x1f   : > { %s220_s11 = sand.u32 1, %s4060_s20   ;;  %s3717_s7 = smul.u32 448, %s4064_s21 }
  0x20   : > { %s3716_s12 = smul.u32 448, %s220_s11  ;;  %p4199_p9 = pnand %p3756_p3, %p39_p5 }
  0x21   : > { %s230_s15 = scalar_lea.hbm %s4952_s0, %s3717_s7  ;;  %s221_s27 = scalar_lea.sflag [#allocation3], %s220_s11 }
  0x22   : > { %s231_s17 = sshll.u32 %s230_s15, 4  ;;  %s224_s23 = scalar_lea.vmem [#allocation2], %s3716_s12  ;;  %s232_s17 = int_to_ptr.hbm [resolvable:$true] %s231_s17 }
  0x23   : > { %s233_s26 = sshll.u32 %s224_s23, 4  ;;  %s3960_s28 = sshra.s32 %s232_s17, 4  ;;  %s234_s26 = int_to_ptr.vmem [resolvable:$true] %s233_s26  ;;  %s3961_s28 = int_to_ptr.hbm [resolvable:$true] %s3960_s28 }
  0x24   : > { %s3962_s6 = scalar_lea.hbm %s3961_s28, 448  ;;  %p3964_p10 = pneg %p4199_p9 }
  0x25   : > { %p3963_p2 = scmp.ne.s32.totalorder %s3961_s28, %s3962_s6  ;;  %s3967_s13 = scalar_lea.hbm %s4952_s0, 896 }
  0x26   : > { %p3968_p0 = scmp.lt.s32.totalorder %s3961_s28, %s4952_s0  ;;  %p3969_p3 = scmp.lt.s32.totalorder %s3967_s13, %s3962_s6 }
  0x27   : > { %p3965_p12 = pnand %p3964_p10, %p3963_p2 }
  0x28   : > { %p3970_p5 = por %p3969_p3, %p3968_p0 }
  0x29   : > { %p3966_p13 = pneg %p3965_p12 }
  0x2b   : > { %p3971_p11 = pnand %p3970_p5, %p3966_p13 }
  0x2d   : > { %3974 = shalt.err (!%p3971_p11)
}
  0x2e   : > { %s4073_s11 = smov 448   ;;  %s4074_s12 = smov 28  }
  0x2f   : > { %3748 = dma.hbm_to_vmem [thread:$0]  (!%p4199_p9), %s232_s17, 7168, %s234_s26, %s221_s27, %s4073_s11, %s4073_s11, %s4074_s12  }
  0x30   : > { %245 = sbr.rel (%p4150_p8) target bundleno = 1142 (0x476), region = 40 }
  0x35   : > { %s4216_s15 = sand.u32 1, %s4056_s19  }
  0x36   : > { %s3718_s1 = smul.u32 448, %s4216_s15  ;;  %s248_s23 = scalar_lea.sflag [#allocation3], %s4216_s15 }
  0x38   : > { %s4220_s28 = scalar_lea.vmem [#allocation2], %s3718_s1 }
  0x39   : > { %4035 = dma.done.wait (%p4137_p4), %s248_s23, 7168  }
  0x3a   : > { %4037 = vsyncadd (%p4137_p4), %s248_s23, 4294960128 }
  0x3b   : > { %4039 = dma.done.wait (%p44_p1), [#allocation6], 14368  }
  0x3c   : > { %4041 = vsyncadd (%p44_p1), [#allocation6], 4294952928 }
  0x3d   : > { %4043 = dma.done.wait (%p44_p1), [#allocation9], 2048  }
  0x3e   : > { %4045 = vsyncadd (%p44_p1), [#allocation9], 4294965248  ;;  %v3072_v0 = vld [vmem:[#allocation5 + $0x70] sm:$0xf]  ;;  %v3602_v1 = vld [vmem:[#allocation5 + $0x74] sm:$0xf0] }
  0x3f   : > { %v3136_v2 = vld [vmem:[#allocation5 + $0xf0] sm:$0xf]  ;;  %v3073_v3 = vor.u32 %v3602_v1, %v3072_v0  ;;  %v3618_v4 = vld [vmem:[#allocation5 + $0xf4] sm:$0xf0]  ;;  %v3064_v11 = vld [vmem:[#allocation5 + $0x60] sm:$0xf] }
  0x40   : > { %v3200_v5 = vld [vmem:[#allocation5 + $0x170] sm:$0xf]  ;;  %v3634_v6 = vld [vmem:[#allocation5 + $0x174] sm:$0xf0]  ;;  %v3137_v7 = vor.u32 %v3618_v4, %v3136_v2  ;;  %v3600_v13 = vld [vmem:[#allocation5 + $0x64] sm:$0xf0] }
  0x41   : > { %v3201_v8 = vor.u32 %v3634_v6, %v3200_v5  ;;  %v3264_v9 = vld [vmem:[#allocation5 + $0x1f0] sm:$0xf]  ;;  %v3650_v10 = vld [vmem:[#allocation5 + $0x1f4] sm:$0xf0]  ;;  %1326 = vmatpush.bf16.msra.mxu0 %v3073_v3  ;;  %v3128_v14 = vld [vmem:[#allocation5 + $0xe0] sm:$0xf]  ;;  %v3065_v16 = vor.u32 %v3600_v13, %v3064_v11 }
  0x42   : > { %v3265_v12 = vor.u32 %v3650_v10, %v3264_v9  ;;  %v3616_v15 = vld [vmem:[#allocation5 + $0xe4] sm:$0xf0]  ;;  %1375 = vmatpush.bf16.msra.mxu1 %v3137_v7  ;;  %v3192_v18 = vld [vmem:[#allocation5 + $0x160] sm:$0xf]  ;;  %v3056_v23 = vld [vmem:[#allocation5 + $0x50] sm:$0xf] }
  0x43   : > { %1424 = vmatpush.bf16.msra.mxu2 %v3201_v8  ;;  %v3129_v17 = vor.u32 %v3616_v15, %v3128_v14  ;;  %v3632_v19 = vld [vmem:[#allocation5 + $0x164] sm:$0xf0]  ;;  %v3256_v20 = vld [vmem:[#allocation5 + $0x1e0] sm:$0xf]  ;;  %v3598_v24 = vld [vmem:[#allocation5 + $0x54] sm:$0xf0] }
  0x44   : > { %1473 = vmatpush.bf16.msra.mxu3 %v3265_v12  ;;  %v3193_v21 = vor.u32 %v3632_v19, %v3192_v18  ;;  %v3648_v22 = vld [vmem:[#allocation5 + $0x1e4] sm:$0xf0]  ;;  %v3120_v26 = vld [vmem:[#allocation5 + $0xd0] sm:$0xf]  ;;  %v3614_v27 = vld [vmem:[#allocation5 + $0xd4] sm:$0xf0]  ;;  %v3057_v29 = vor.u32 %v3598_v24, %v3056_v23 }
  0x45   : > { %v3257_v25 = vor.u32 %v3648_v22, %v3256_v20  ;;  %v3184_v28 = vld [vmem:[#allocation5 + $0x150] sm:$0xf]  ;;  %1327 = vmatpush.bf16.msra.mxu0 %v3065_v16  ;;  %v3630_v30 = vld [vmem:[#allocation5 + $0x154] sm:$0xf0]  ;;  %v3121_v33 = vor.u32 %v3614_v27, %v3120_v26  ;;  %v3048_v35 = vld [vmem:[#allocation5 + $0x40] sm:$0xf] }
  0x46   : > { %v3248_v31 = vld [vmem:[#allocation5 + $0x1d0] sm:$0xf]  ;;  %v3646_v32 = vld [vmem:[#allocation5 + $0x1d4] sm:$0xf0]  ;;  %1376 = vmatpush.bf16.msra.mxu1 %v3129_v17  ;;  %v3185_v34 = vor.u32 %v3630_v30, %v3184_v28  ;;  %v3596_v36 = vld [vmem:[#allocation5 + $0x44] sm:$0xf0] }
  0x47   : > { %1425 = vmatpush.bf16.msra.mxu2 %v3193_v21  ;;  %v3112_v37 = vld [vmem:[#allocation5 + $0xc0] sm:$0xf]  ;;  %v3249_v38 = vor.u32 %v3646_v32, %v3248_v31  ;;  %v3612_v39 = vld [vmem:[#allocation5 + $0xc4] sm:$0xf0]  ;;  %v3049_v44 = vor.u32 %v3596_v36, %v3048_v35  ;;  %v3040_v47 = vld [vmem:[#allocation5 + $0x30] sm:$0xf] }
  0x48   : > { %1474 = vmatpush.bf16.msra.mxu3 %v3257_v25  ;;  %v3176_v40 = vld [vmem:[#allocation5 + $0x140] sm:$0xf]  ;;  %v3628_v41 = vld [vmem:[#allocation5 + $0x144] sm:$0xf0]  ;;  %v3113_v45 = vor.u32 %v3612_v39, %v3112_v37  ;;  %v3594_v48 = vld [vmem:[#allocation5 + $0x34] sm:$0xf0] }
  0x49   : > { %v3240_v42 = vld [vmem:[#allocation5 + $0x1c0] sm:$0xf]  ;;  %v3644_v43 = vld [vmem:[#allocation5 + $0x1c4] sm:$0xf0]  ;;  %1328 = vmatpush.bf16.msra.mxu0 %v3057_v29  ;;  %v3177_v46 = vor.u32 %v3628_v41, %v3176_v40  ;;  %v3104_v49 = vld [vmem:[#allocation5 + $0xb0] sm:$0xf]  ;;  %v3041_v56 = vor.u32 %v3594_v48, %v3040_v47 }
  0x4a   : > { %1377 = vmatpush.bf16.msra.mxu1 %v3121_v33  ;;  %v3241_v50 = vor.u32 %v3644_v43, %v3240_v42  ;;  %v3610_v51 = vld [vmem:[#allocation5 + $0xb4] sm:$0xf0]  ;;  %v3168_v52 = vld [vmem:[#allocation5 + $0x130] sm:$0xf]  ;;  %v3032_v59 = vld [vmem:[#allocation5 + $0x20] sm:$0xf] }
  0x4b   : > { %1426 = vmatpush.bf16.msra.mxu2 %v3185_v34  ;;  %v3626_v53 = vld [vmem:[#allocation5 + $0x134] sm:$0xf0]  ;;  %v3232_v54 = vld [vmem:[#allocation5 + $0x1b0] sm:$0xf]  ;;  %v3105_v57 = vor.u32 %v3610_v51, %v3104_v49  ;;  %v3592_v60 = vld [vmem:[#allocation5 + $0x24] sm:$0xf0] }
  0x4c   : > { %1475 = vmatpush.bf16.msra.mxu3 %v3249_v38  ;;  %v3642_v55 = vld [vmem:[#allocation5 + $0x1b4] sm:$0xf0]  ;;  %v3169_v58 = vor.u32 %v3626_v53, %v3168_v52  ;;  %v3096_v61 = vld [vmem:[#allocation5 + $0xa0] sm:$0xf]  ;;  %v3608_v63 = vld [vmem:[#allocation5 + $0xa4] sm:$0xf0]  ;;  %v3033_v4 = vor.u32 %v3592_v60, %v3032_v59 }
  0x4d   : > { %1329 = vmatpush.bf16.msra.mxu0 %v3049_v44  ;;  %v3233_v62 = vor.u32 %v3642_v55, %v3232_v54  ;;  %v3160_v0 = vld [vmem:[#allocation5 + $0x120] sm:$0xf]  ;;  %v3624_v1 = vld [vmem:[#allocation5 + $0x124] sm:$0xf0]  ;;  %v3097_v5 = vor.u32 %v3608_v63, %v3096_v61  ;;  %v3024_v7 = vld [vmem:[#allocation5 + $0x10] sm:$0xf] }
  0x4e   : > { %1378 = vmatpush.bf16.msra.mxu1 %v3113_v45  ;;  %v3224_v2 = vld [vmem:[#allocation5 + $0x1a0] sm:$0xf]  ;;  %v3640_v3 = vld [vmem:[#allocation5 + $0x1a4] sm:$0xf0]  ;;  %v3161_v6 = vor.u32 %v3624_v1, %v3160_v0  ;;  %v3590_v8 = vld [vmem:[#allocation5 + $0x14] sm:$0xf0] }
  0x4f   : > { %1427 = vmatpush.bf16.msra.mxu2 %v3177_v46  ;;  %v3088_v9 = vld [vmem:[#allocation5 + $0x90] sm:$0xf]  ;;  %v3225_v10 = vor.u32 %v3640_v3, %v3224_v2  ;;  %v3606_v11 = vld [vmem:[#allocation5 + $0x94] sm:$0xf0]  ;;  %v3025_v16 = vor.u32 %v3590_v8, %v3024_v7  ;;  %v3016_v17 = vld [vmem:[#allocation5] sm:$0xf] }
  0x50   : > { %1476 = vmatpush.bf16.msra.mxu3 %v3241_v50  ;;  %v3152_v12 = vld [vmem:[#allocation5 + $0x110] sm:$0xf]  ;;  %v3622_v13 = vld [vmem:[#allocation5 + $0x114] sm:$0xf0]  ;;  %v3588_v18 = vld [vmem:[#allocation5 + $0x4] sm:$0xf0]  ;;  %v3089_v20 = vor.u32 %v3606_v11, %v3088_v9 }
  0x51   : > { %1330 = vmatpush.bf16.msra.mxu0 %v3041_v56  ;;  %v3216_v14 = vld [vmem:[#allocation5 + $0x190] sm:$0xf]  ;;  %v3638_v15 = vld [vmem:[#allocation5 + $0x194] sm:$0xf0]  ;;  %v3080_v19 = vld [vmem:[#allocation5 + $0x80] sm:$0xf]  ;;  %v3153_v21 = vor.u32 %v3622_v13, %v3152_v12  ;;  %v3017_v32 = vor.u32 %v3588_v18, %v3016_v17 }
  0x52   : > { %1379 = vmatpush.bf16.msra.mxu1 %v3105_v57  ;;  %v3604_v22 = vld [vmem:[#allocation5 + $0x84] sm:$0xf0]  ;;  %v3144_v23 = vld [vmem:[#allocation5 + $0x100] sm:$0xf]  ;;  %v3217_v25 = vor.u32 %v3638_v15, %v3216_v14  ;;  %v3534_v29 = vld [vmem:[%s4220_s28 + $0x18] sm:$0xf0] }
  0x53   : > { %1428 = vmatpush.bf16.msra.mxu2 %v3169_v58  ;;  %v3620_v24 = vld [vmem:[#allocation5 + $0x104] sm:$0xf0]  ;;  %v3208_v26 = vld [vmem:[#allocation5 + $0x180] sm:$0xf]  ;;  %v3328_v30 = vld [vmem:[#allocation5 + $0x270] sm:$0xf]  ;;  %v3081_v36 = vor.u32 %v3604_v22, %v3080_v19 }
  0x54   : > { %1477 = vmatpush.bf16.msra.mxu3 %v3233_v62  ;;  %v3636_v27 = vld [vmem:[#allocation5 + $0x184] sm:$0xf0]  ;;  %v2792_v28 = vld [vmem:[%s4220_s28] sm:$0xf]  ;;  %v3666_v31 = vld [vmem:[#allocation5 + $0x274] sm:$0xf0]  ;;  %v3145_v37 = vor.u32 %v3620_v24, %v3144_v23 }
  0x55   : > { %1331 = vmatpush.bf16.msra.mxu0 %v3033_v4  ;;  %v3531_v33 = vld [vmem:[%s4220_s28 + $0x4] sm:$0xf]  ;;  %v3392_v34 = vld [vmem:[#allocation5 + $0x2f0] sm:$0xf]  ;;  %v3682_v35 = vld [vmem:[#allocation5 + $0x2f4] sm:$0xf0]  ;;  %v3209_v41 = vor.u32 %v3636_v27, %v3208_v26  ;;  %v3329_v42 = vor.u32 %v3666_v31, %v3328_v30  ;;  %v4242_v45 = vor.u32 %v3534_v29, %v2792_v28 }
  0x56   : > { %1380 = vmatpush.bf16.msra.mxu1 %v3097_v5  ;;  %v2794_v38 = vld [vmem:[%s4220_s28 + $0x1c] sm:$0xf0]  ;;  %v2800_v39 = vld [vmem:[%s4220_s28 + $0x8] sm:$0xf]  ;;  %v3535_v40 = vld [vmem:[%s4220_s28 + $0x20] sm:$0xf0]  ;;  %v3393_v46 = vor.u32 %v3682_v35, %v3392_v34 }
  0x57   : > { %1429 = vmatpush.bf16.msra.mxu2 %v3161_v6  ;;  %v3532_v43 = vld [vmem:[%s4220_s28 + $0xc] sm:$0xf]  ;;  %v2802_v44 = vld [vmem:[%s4220_s28 + $0x24] sm:$0xf0]  ;;  %v3320_v47 = vld [vmem:[#allocation5 + $0x260] sm:$0xf]  ;;  %v4244_v49 = vor.u32 %v3531_v33, %v2794_v38  ;;  %v4246_v50 = vor.u32 %v3535_v40, %v2800_v39 }
  0x58   : > { %1478 = vmatpush.bf16.msra.mxu3 %v3225_v10  ;;  %v3664_v48 = vld [vmem:[#allocation5 + $0x264] sm:$0xf0]  ;;  %v3384_v51 = vld [vmem:[#allocation5 + $0x2e0] sm:$0xf]  ;;  %v4248_v53 = vor.u32 %v3532_v43, %v2802_v44  ;;  %v3312_v56 = vld [vmem:[#allocation5 + $0x250] sm:$0xf] }
  0x59   : > { %1332 = vmatpush.bf16.msra.mxu0 %v3025_v16  ;;  %v3680_v52 = vld [vmem:[#allocation5 + $0x2e4] sm:$0xf0]  ;;  %v3321_v54 = vor.u32 %v3664_v48, %v3320_v47  ;;  %v3662_v57 = vld [vmem:[#allocation5 + $0x254] sm:$0xf0]  ;;  %v3376_v58 = vld [vmem:[#allocation5 + $0x2d0] sm:$0xf] }
  0x5a   : > { %1381 = vmatpush.bf16.msra.mxu1 %v3089_v20  ;;  %v3385_v55 = vor.u32 %v3680_v52, %v3384_v51  ;;  %v3678_v59 = vld [vmem:[#allocation5 + $0x2d4] sm:$0xf0]  ;;  %v3313_v60 = vor.u32 %v3662_v57, %v3312_v56  ;;  %v3541_v63 = vld [vmem:[%s4220_s28 + $0x50] sm:$0xf0]  ;;  %v3538_v0 = vld [vmem:[%s4220_s28 + $0x3c] sm:$0xf] }
  0x5b   : > { %1430 = vmatpush.bf16.msra.mxu2 %v3153_v21  ;;  %v3377_v61 = vor.u32 %v3678_v59, %v3376_v58  ;;  %v2820_v62 = vld [vmem:[%s4220_s28 + $0x38] sm:$0xf]  ;;  %v2828_v2 = vld [vmem:[%s4220_s28 + $0x40] sm:$0xf]  ;;  %v3542_v3 = vld [vmem:[%s4220_s28 + $0x58] sm:$0xf0] }
  0x5c   : > { %1479 = vmatpush.bf16.msra.mxu3 %v3217_v25  ;;  %v2822_v1 = vld [vmem:[%s4220_s28 + $0x54] sm:$0xf0]  ;;  %v3539_v4 = vld [vmem:[%s4220_s28 + $0x44] sm:$0xf]  ;;  %v2830_v5 = vld [vmem:[%s4220_s28 + $0x5c] sm:$0xf0]  ;;  %v4262_v6 = vor.u32 %v3541_v63, %v2820_v62  ;;  %v4266_v8 = vor.u32 %v3542_v3, %v2828_v2 }
  0x5d   : > { %1333 = vmatpush.bf16.msra.mxu0 %v3017_v32  ;;  %v4264_v7 = vor.u32 %v3538_v0, %v2822_v1  ;;  %v4268_v9 = vor.u32 %v3539_v4, %v2830_v5  ;;  %v3304_v10 = vld [vmem:[#allocation5 + $0x240] sm:$0xf]  ;;  %v3660_v11 = vld [vmem:[#allocation5 + $0x244] sm:$0xf0]  ;;  %v2848_v16 = vld [vmem:[%s4220_s28 + $0x70] sm:$0xf] }
  0x5e   : > { %1382 = vmatpush.bf16.msra.mxu1 %v3081_v36  ;;  %v3305_v12 = vor.u32 %v3660_v11, %v3304_v10  ;;  %v3368_v13 = vld [vmem:[#allocation5 + $0x2c0] sm:$0xf]  ;;  %v3676_v14 = vld [vmem:[#allocation5 + $0x2c4] sm:$0xf0]  ;;  %v3548_v17 = vld [vmem:[%s4220_s28 + $0x88] sm:$0xf0] }
  0x5f   : > { %1431 = vmatpush.bf16.msra.mxu2 %v3145_v37  ;;  %v3369_v15 = vor.u32 %v3676_v14, %v3368_v13  ;;  %v3545_v18 = vld [vmem:[%s4220_s28 + $0x74] sm:$0xf]  ;;  %v2850_v19 = vld [vmem:[%s4220_s28 + $0x8c] sm:$0xf0]  ;;  %v2856_v20 = vld [vmem:[%s4220_s28 + $0x78] sm:$0xf]  ;;  %v4282_v24 = vor.u32 %v3548_v17, %v2848_v16 }
  0x60   : > { %1480 = vmatpush.bf16.msra.mxu3 %v3209_v41  ;;  %1334 = vmatmul.bf16.vlgmr.msra.gmra.mxu0 %v4242_v45  ;;  %v3549_v21 = vld [vmem:[%s4220_s28 + $0x90] sm:$0xf0]  ;;  %v3546_v22 = vld [vmem:[%s4220_s28 + $0x7c] sm:$0xf]  ;;  %v2858_v23 = vld [vmem:[%s4220_s28 + $0x94] sm:$0xf0]  ;;  %v4284_v25 = vor.u32 %v3545_v18, %v2850_v19 }
  0x61   : > { %1522 = vmatpush.bf16.msrb.mxu0 %v3329_v42  ;;  %1383 = vmatmul.bf16.vlgmr.msra.gmra.mxu1 %v4244_v49  ;;  %v4286_v26 = vor.u32 %v3549_v21, %v2856_v20  ;;  %v4288_v27 = vor.u32 %v3546_v22, %v2858_v23  ;;  %v3296_v28 = vld [vmem:[#allocation5 + $0x230] sm:$0xf]  ;;  %v3658_v29 = vld [vmem:[#allocation5 + $0x234] sm:$0xf0]  ;;  %v2876_v34 = vld [vmem:[%s4220_s28 + $0xa8] sm:$0xf] }
  0x62   : > { %1571 = vmatpush.bf16.msrb.mxu1 %v3393_v46  ;;  %1432 = vmatmul.bf16.vlgmr.msra.gmra.mxu2 %v4246_v50  ;;  %v3297_v30 = vor.u32 %v3658_v29, %v3296_v28  ;;  %v3360_v31 = vld [vmem:[#allocation5 + $0x2b0] sm:$0xf]  ;;  %v3674_v32 = vld [vmem:[#allocation5 + $0x2b4] sm:$0xf0]  ;;  %v3555_v35 = vld [vmem:[%s4220_s28 + $0xc0] sm:$0xf0] }
  0x63   : > { %1481 = vmatmul.bf16.vlgmr.msra.gmra.mxu3 %v4248_v53  ;;  %v3361_v33 = vor.u32 %v3674_v32, %v3360_v31  ;;  %v3552_v36 = vld [vmem:[%s4220_s28 + $0xac] sm:$0xf]  ;;  %v2878_v37 = vld [vmem:[%s4220_s28 + $0xc4] sm:$0xf0]  ;;  %v2884_v38 = vld [vmem:[%s4220_s28 + $0xb0] sm:$0xf]  ;;  %v4302_v42 = vor.u32 %v3555_v35, %v2876_v34 }
  0x64   : > { %v3556_v39 = vld [vmem:[%s4220_s28 + $0xc8] sm:$0xf0]  ;;  %v3553_v40 = vld [vmem:[%s4220_s28 + $0xb4] sm:$0xf]  ;;  %v2886_v41 = vld [vmem:[%s4220_s28 + $0xcc] sm:$0xf0]  ;;  %v4304_v43 = vor.u32 %v3552_v36, %v2878_v37 }
  0x65   : > { %1523 = vmatpush.bf16.msrb.mxu0 %v3321_v54  ;;  %v4306_v44 = vor.u32 %v3556_v39, %v2884_v38  ;;  %v4308_v46 = vor.u32 %v3553_v40, %v2886_v41  ;;  %v3288_v47 = vld [vmem:[#allocation5 + $0x220] sm:$0xf]  ;;  %v3656_v48 = vld [vmem:[#allocation5 + $0x224] sm:$0xf0]  ;;  %v3562_v57 = vld [vmem:[%s4220_s28 + $0xf8] sm:$0xf0] }
  0x66   : > { %1572 = vmatpush.bf16.msrb.mxu1 %v3385_v55  ;;  %v3289_v51 = vor.u32 %v3656_v48, %v3288_v47  ;;  %v3352_v52 = vld [vmem:[#allocation5 + $0x2a0] sm:$0xf]  ;;  %v3672_v54 = vld [vmem:[#allocation5 + $0x2a4] sm:$0xf0]  ;;  %v3559_v58 = vld [vmem:[%s4220_s28 + $0xe4] sm:$0xf] }
  0x67   : > { %v3353_v55 = vor.u32 %v3672_v54, %v3352_v52  ;;  %v2904_v56 = vld [vmem:[%s4220_s28 + $0xe0] sm:$0xf]  ;;  %v3560_v62 = vld [vmem:[%s4220_s28 + $0xec] sm:$0xf]  ;;  %v2914_v63 = vld [vmem:[%s4220_s28 + $0x104] sm:$0xf0] }
  0x68   : > { %v2906_v59 = vld [vmem:[%s4220_s28 + $0xfc] sm:$0xf0]  ;;  %v4322_v0 = vor.u32 %v3562_v57, %v2904_v56  ;;  %v4328_v3 = vor.u32 %v3560_v62, %v2914_v63  ;;  %v3456_v4 = vld [vmem:[#allocation5 + $0x370] sm:$0xf]  ;;  %v3698_v5 = vld [vmem:[#allocation5 + $0x374] sm:$0xf0] }
  0x69   : > { %1524 = vmatpush.bf16.msrb.mxu0 %v3313_v60  ;;  %v2912_v60 = vld [vmem:[%s4220_s28 + $0xe8] sm:$0xf]  ;;  %v4324_v1 = vor.u32 %v3559_v58, %v2906_v59  ;;  %v3457_v10 = vor.u32 %v3698_v5, %v3456_v4  ;;  %v3280_v11 = vld [vmem:[#allocation5 + $0x210] sm:$0xf]  ;;  %v3601_v13 = vld [vmem:[#allocation5 + $0x74] sm:$0xf] }
  0x6a   : > { %1573 = vmatpush.bf16.msrb.mxu1 %v3377_v61  ;;  %v3563_v61 = vld [vmem:[%s4220_s28 + $0x100] sm:$0xf0]  ;;  %v3670_v16 = vld [vmem:[#allocation5 + $0x294] sm:$0xf0]  ;;  %v3074_v17 = vld [vmem:[#allocation5 + $0x78] sm:$0xf0] }
  0x6b   : > { %v4326_v2 = vor.u32 %v3563_v61, %v2912_v60  ;;  %1620 = vmatpush.bf16.msrb.mxu2 %v3457_v10  ;;  %v3077_v19 = vor.u32 %v3601_v13, %v3074_v17  ;;  %v3448_v20 = vld [vmem:[#allocation5 + $0x360] sm:$0xf]  ;;  %v3696_v21 = vld [vmem:[#allocation5 + $0x364] sm:$0xf0]  ;;  %v3599_v22 = vld [vmem:[#allocation5 + $0x64] sm:$0xf] }
  0x6c   : > { %v3449_v23 = vor.u32 %v3696_v21, %v3448_v20  ;;  %v3066_v28 = vld [vmem:[#allocation5 + $0x68] sm:$0xf0]  ;;  %v3440_v29 = vld [vmem:[#allocation5 + $0x350] sm:$0xf]  ;;  %v3058_v34 = vld [vmem:[#allocation5 + $0x58] sm:$0xf0] }
  0x6d   : > { %1525 = vmatpush.bf16.msrb.mxu0 %v3305_v12  ;;  %v3654_v12 = vld [vmem:[#allocation5 + $0x214] sm:$0xf0]  ;;  %1669 = vmatpush.bf16.msrb.mxu3 %v3077_v19  ;;  %v3069_v31 = vor.u32 %v3599_v22, %v3066_v28  ;;  %v3432_v35 = vld [vmem:[#allocation5 + $0x340] sm:$0xf]  ;;  %v3692_v36 = vld [vmem:[#allocation5 + $0x344] sm:$0xf0] }
  0x6e   : > { %1574 = vmatpush.bf16.msrb.mxu1 %v3369_v15  ;;  %v3281_v14 = vor.u32 %v3654_v12, %v3280_v11  ;;  %v3344_v15 = vld [vmem:[#allocation5 + $0x290] sm:$0xf]  ;;  %v2932_v37 = vld [vmem:[%s4220_s28 + $0x118] sm:$0xf]  ;;  %v3569_v38 = vld [vmem:[%s4220_s28 + $0x130] sm:$0xf0] }
  0x6f   : > { %v3345_v18 = vor.u32 %v3670_v16, %v3344_v15  ;;  %1621 = vmatpush.bf16.msrb.mxu2 %v3449_v23  ;;  %v3566_v39 = vld [vmem:[%s4220_s28 + $0x11c] sm:$0xf]  ;;  %v2934_v41 = vld [vmem:[%s4220_s28 + $0x134] sm:$0xf0]  ;;  %v2940_v47 = vld [vmem:[%s4220_s28 + $0x120] sm:$0xf] }
  0x70   : > { %1339 = vmatmul.bf16.gmra.mxu0 %v4262_v6  ;;  %v3570_v48 = vld [vmem:[%s4220_s28 + $0x138] sm:$0xf0]  ;;  %v3567_v52 = vld [vmem:[%s4220_s28 + $0x124] sm:$0xf]  ;;  %v2942_v54 = vld [vmem:[%s4220_s28 + $0x13c] sm:$0xf0]  ;;  %v4344_v58 = vor.u32 %v3566_v39, %v2934_v41 }
  0x71   : > { %1388 = vmatmul.bf16.gmra.mxu1 %v4264_v7  ;;  %1526 = vmatpush.bf16.msrb.mxu0 %v3297_v30  ;;  %v3694_v30 = vld [vmem:[#allocation5 + $0x354] sm:$0xf0]  ;;  %v3595_v56 = vld [vmem:[#allocation5 + $0x44] sm:$0xf]  ;;  %v3050_v57 = vld [vmem:[#allocation5 + $0x48] sm:$0xf0]  ;;  %v4346_v59 = vor.u32 %v3570_v48, %v2940_v47  ;;  %v4348_v60 = vor.u32 %v3567_v52, %v2942_v54 }
  0x72   : > { %1437 = vmatmul.bf16.gmra.mxu2 %v4266_v8  ;;  %1575 = vmatpush.bf16.msrb.mxu1 %v3361_v33  ;;  %v3441_v32 = vor.u32 %v3694_v30, %v3440_v29  ;;  %v3597_v33 = vld [vmem:[#allocation5 + $0x54] sm:$0xf]  ;;  %v3053_v61 = vor.u32 %v3595_v56, %v3050_v57  ;;  %v3424_v62 = vld [vmem:[#allocation5 + $0x330] sm:$0xf]  ;;  %v3690_v63 = vld [vmem:[#allocation5 + $0x334] sm:$0xf0] }
  0x73   : > { %1486 = vmatmul.bf16.gmra.mxu3 %v4268_v9  ;;  %v3061_v40 = vor.u32 %v3597_v33, %v3058_v34  ;;  %v3425_v4 = vor.u32 %v3690_v63, %v3424_v62  ;;  %v3272_v5 = vld [vmem:[#allocation5 + $0x200] sm:$0xf]  ;;  %v3652_v10 = vld [vmem:[#allocation5 + $0x204] sm:$0xf0]  ;;  %v3593_v11 = vld [vmem:[#allocation5 + $0x34] sm:$0xf] }
  0x74   : > { %1670 = vmatpush.bf16.msrb.mxu3 %v3069_v31  ;;  %1622 = vmatpush.bf16.msrb.mxu2 %v3441_v32  ;;  %v3273_v12 = vor.u32 %v3652_v10, %v3272_v5  ;;  %v3336_v13 = vld [vmem:[#allocation5 + $0x280] sm:$0xf]  ;;  %v3042_v15 = vld [vmem:[#allocation5 + $0x38] sm:$0xf0]  ;;  %v3688_v19 = vld [vmem:[#allocation5 + $0x324] sm:$0xf0] }
  0x75   : > { %1527 = vmatpush.bf16.msrb.mxu0 %v3289_v51  ;;  %v3433_v51 = vor.u32 %v3692_v36, %v3432_v35  ;;  %v3045_v17 = vor.u32 %v3593_v11, %v3042_v15  ;;  %v3591_v20 = vld [vmem:[#allocation5 + $0x24] sm:$0xf]  ;;  %v3034_v22 = vld [vmem:[#allocation5 + $0x28] sm:$0xf0]  ;;  %v3408_v23 = vld [vmem:[#allocation5 + $0x310] sm:$0xf] }
  0x76   : > { %1576 = vmatpush.bf16.msrb.mxu1 %v3353_v55  ;;  %v4342_v55 = vor.u32 %v3569_v38, %v2932_v37  ;;  %v3686_v28 = vld [vmem:[#allocation5 + $0x314] sm:$0xf0]  ;;  %v3037_v30 = vor.u32 %v3591_v20, %v3034_v22  ;;  %v2960_v31 = vld [vmem:[%s4220_s28 + $0x150] sm:$0xf]  ;;  %v3589_v32 = vld [vmem:[#allocation5 + $0x14] sm:$0xf] }
  0x77   : > { %v3409_v29 = vor.u32 %v3686_v28, %v3408_v23  ;;  %v3026_v33 = vld [vmem:[#allocation5 + $0x18] sm:$0xf0]  ;;  %v3576_v34 = vld [vmem:[%s4220_s28 + $0x168] sm:$0xf0]  ;;  %v3573_v35 = vld [vmem:[%s4220_s28 + $0x154] sm:$0xf] }
  0x78   : > { %1671 = vmatpush.bf16.msrb.mxu3 %v3061_v40  ;;  %1623 = vmatpush.bf16.msrb.mxu2 %v3433_v51  ;;  %v2962_v36 = vld [vmem:[%s4220_s28 + $0x16c] sm:$0xf0]  ;;  %v2968_v37 = vld [vmem:[%s4220_s28 + $0x158] sm:$0xf]  ;;  %v3577_v38 = vld [vmem:[%s4220_s28 + $0x170] sm:$0xf0]  ;;  %v3029_v41 = vor.u32 %v3589_v32, %v3026_v33  ;;  %v4362_v51 = vor.u32 %v3576_v34, %v2960_v31 }
  0x79   : > { %1528 = vmatpush.bf16.msrb.mxu0 %v3281_v14  ;;  %v3668_v14 = vld [vmem:[#allocation5 + $0x284] sm:$0xf0]  ;;  %v3574_v39 = vld [vmem:[%s4220_s28 + $0x15c] sm:$0xf]  ;;  %v2970_v40 = vld [vmem:[%s4220_s28 + $0x174] sm:$0xf0]  ;;  %v4364_v54 = vor.u32 %v3573_v35, %v2962_v36  ;;  %v4366_v56 = vor.u32 %v3577_v38, %v2968_v37 }
  0x7a   : > { %1577 = vmatpush.bf16.msrb.mxu1 %v3345_v18  ;;  %v3337_v16 = vor.u32 %v3668_v14, %v3336_v13  ;;  %v3416_v18 = vld [vmem:[#allocation5 + $0x320] sm:$0xf]  ;;  %v3684_v48 = vld [vmem:[#allocation5 + $0x304] sm:$0xf0]  ;;  %v3587_v57 = vld [vmem:[#allocation5 + $0x4] sm:$0xf]  ;;  %v4368_v62 = vor.u32 %v3574_v39, %v2970_v40 }
  0x7b   : > { %v3417_v21 = vor.u32 %v3688_v19, %v3416_v18  ;;  %v3400_v47 = vld [vmem:[#allocation5 + $0x300] sm:$0xf]  ;;  %4984 = vst [vmem:[#allocation15_spill] sm:$0xff] %v4366_v56  ;;  %v3138_v5 = vld [vmem:[#allocation5 + $0xf8] sm:$0xf0]  ;;  %s2789_s16 = sshll.u32 %s4216_s15, 7 }
  0x7c   : > { %1624 = vmatpush.bf16.msrb.mxu2 %v3425_v4  ;;  %1672 = vmatpush.bf16.msrb.mxu3 %v3053_v61  ;;  %v3401_v52 = vor.u32 %v3684_v48, %v3400_v47  ;;  %v3018_v61 = vld [vmem:[#allocation5 + $0x8] sm:$0xf0]  ;;  %4985 = vst [vmem:[#allocation16_spill] sm:$0xff] %v4368_v62  ;;  %v3617_v4 = vld [vmem:[#allocation5 + $0xf4] sm:$0xf]  ;;  %s4885_s17 = scalar_lea.vmem [#allocation10], %s2789_s16 }
  0x7d   : > { %1529 = vmatpush.bf16.msrb.mxu0 %v3273_v12  ;;  %v3021_v63 = vor.u32 %v3587_v57, %v3018_v61  ;;  %v3141_v10 = vor.u32 %v3617_v4, %v3138_v5  ;;  %v3633_v11 = vld [vmem:[#allocation5 + $0x174] sm:$0xf]  ;;  %v3202_v12 = vld [vmem:[#allocation5 + $0x178] sm:$0xf0]  ;;  %v2988_v14 = vld [vmem:[%s4220_s28 + $0x188] sm:$0xf] }
  0x7e   : > { %1578 = vmatpush.bf16.msrb.mxu1 %v3337_v16  ;;  %v3205_v13 = vor.u32 %v3633_v11, %v3202_v12  ;;  %v3583_v15 = vld [vmem:[%s4220_s28 + $0x1a0] sm:$0xf0]  ;;  %v3580_v16 = vld [vmem:[%s4220_s28 + $0x18c] sm:$0xf]  ;;  %v2996_v18 = vld [vmem:[%s4220_s28 + $0x190] sm:$0xf] }
  0x7f   : > { %v3584_v19 = vld [vmem:[%s4220_s28 + $0x1a8] sm:$0xf0]  ;;  %v3581_v20 = vld [vmem:[%s4220_s28 + $0x194] sm:$0xf]  ;;  %v4382_v22 = vor.u32 %v3583_v15, %v2988_v14  ;;  %v3631_v33 = vld [vmem:[#allocation5 + $0x164] sm:$0xf] }
  0x80   : > { %1344 = vmatmul.bf16.gmra.mxu0 %v4282_v24  ;;  %1625 = vmatpush.bf16.msrb.mxu2 %v3417_v21  ;;  %v2998_v21 = vld [vmem:[%s4220_s28 + $0x1ac] sm:$0xf0]  ;;  %v4386_v28 = vor.u32 %v3584_v19, %v2996_v18  ;;  %v3130_v31 = vld [vmem:[#allocation5 + $0xe8] sm:$0xf0]  ;;  %v472_v36 = vld [vmem:[#allocation7] sm:$0x3] }
  0x81   : > { %1393 = vmatmul.bf16.gmra.mxu1 %v4284_v25  ;;  %1673 = vmatpush.bf16.msrb.mxu3 %v3045_v17  ;;  %v2990_v17 = vld [vmem:[%s4220_s28 + $0x1a4] sm:$0xf0]  ;;  %v3194_v34 = vld [vmem:[#allocation5 + $0x168] sm:$0xf0]  ;;  %v4394_v37 = vperm.slane %v472_v36, 0  ;;  %s3715_s26 = sshll.u32 %s4128_s22, 7 }
  0x82   : > { %1442 = vmatmul.bf16.gmra.mxu2 %v4286_v26  ;;  %1718 = vmatpush.bf16.msra.mxu0 %v3141_v10  ;;  %v4384_v23 = vor.u32 %v3580_v16, %v2990_v17  ;;  %4987 = vst [vmem:[#allocation18_spill] sm:$0xff] %v4386_v28  ;;  %v3197_v35 = vor.u32 %v3631_v33, %v3194_v34  ;;  %v2808_v38 = vld [vmem:[%s4220_s28 + $0x10] sm:$0xf]  ;;  %v3536_v39 = vld [vmem:[%s4220_s28 + $0x28] sm:$0xf0]  ;;  %s2670_s8 = scalar_lea.hbm %s4957_s5, %s3715_s26  ;;  %s2671_s7 = sshll.u32 %s4885_s17, 4  ;;  %s2672_s7 = int_to_ptr.vmem [resolvable:$true] %s2671_s7 }
  0x83   : > { %1491 = vmatmul.bf16.gmra.mxu3 %v4288_v27  ;;  %1767 = vmatpush.bf16.msra.mxu1 %v3205_v13  ;;  %v3533_v40 = vld [vmem:[%s4220_s28 + $0x14] sm:$0xf]  ;;  %v2816_v47 = vld [vmem:[%s4220_s28 + $0x18] sm:$0xf]  ;;  %v3122_v12 = vld [vmem:[#allocation5 + $0xd8] sm:$0xf0] }
  0x84   : > { %1626 = vmatpush.bf16.msrb.mxu2 %v3409_v29  ;;  %4986 = vst [vmem:[#allocation17_spill] sm:$0xff] %v4384_v23  ;;  %v4388_v29 = vor.u32 %v3581_v20, %v2998_v21  ;;  %v3537_v48 = vld [vmem:[%s4220_s28 + $0x30] sm:$0xf0]  ;;  %v3186_v15 = vld [vmem:[#allocation5 + $0x158] sm:$0xf0]  ;;  %s2673_s22 = sshll.u32 %s2670_s8, 4  ;;  %s2674_s22 = int_to_ptr.hbm [resolvable:$true] %s2673_s22 }
  0x85   : > { %1674 = vmatpush.bf16.msrb.mxu3 %v3037_v30  ;;  %v3615_v30 = vld [vmem:[#allocation5 + $0xe4] sm:$0xf]  ;;  %v3613_v11 = vld [vmem:[#allocation5 + $0xd4] sm:$0xf]  ;;  %v3540_v34 = vld [vmem:[%s4220_s28 + $0x4c] sm:$0xf] }
  0x86   : > { %4988 = vst [vmem:[#allocation19_spill] sm:$0xff] %v4388_v29  ;;  %v3133_v32 = vor.u32 %v3615_v30, %v3130_v31  ;;  %v3125_v13 = vor.u32 %v3613_v11, %v3122_v12  ;;  %v3629_v14 = vld [vmem:[#allocation5 + $0x154] sm:$0xf]  ;;  %v3543_v33 = vld [vmem:[%s4220_s28 + $0x60] sm:$0xf0]  ;;  %s2659_s13 = scalar_lea.sflag [#allocation4], %s4216_s15 }
  0x87   : > { %1768 = vmatpush.bf16.msra.mxu1 %v3197_v35  ;;  %v3189_v16 = vor.u32 %v3629_v14, %v3186_v15  ;;  %v2838_v35 = vld [vmem:[%s4220_s28 + $0x64] sm:$0xf0]  ;;  %v2844_v36 = vld [vmem:[%s4220_s28 + $0x50] sm:$0xf]  ;;  %v3114_v14 = vld [vmem:[#allocation5 + $0xc8] sm:$0xf0] }
  0x88   : > { %1627 = vmatpush.bf16.msrb.mxu2 %v3401_v52  ;;  %1719 = vmatpush.bf16.msra.mxu0 %v3133_v32  ;;  %v4402_v52 = vor.u32 %v3536_v39, %v2808_v38  ;;  %v2836_v32 = vld [vmem:[%s4220_s28 + $0x48] sm:$0xf]  ;;  %v3544_v38 = vld [vmem:[%s4220_s28 + $0x68] sm:$0xf0]  ;;  %s4004_s14 = sshra.s32 %s2674_s22, 4  ;;  %s4010_s23 = scalar_lea.hbm %s4957_s5, 256  ;;  %s4005_s14 = int_to_ptr.hbm [resolvable:$true] %s4004_s14 }
  0x89   : > { %1675 = vmatpush.bf16.msrb.mxu3 %v3029_v41  ;;  %v2810_v41 = vld [vmem:[%s4220_s28 + $0x2c] sm:$0xf0]  ;;  %s4006_s11 = scalar_lea.hbm %s4005_s14, 128  ;;  %p4011_p11 = scmp.lt.s32.totalorder %s4005_s14, %s4957_s5 }
  0x8a   : > { %v4404_v61 = vor.u32 %v3533_v40, %v2810_v41  ;;  %v4422_v40 = vor.u32 %v3543_v33, %v2836_v32  ;;  %p4007_p1 = scmp.ne.s32.totalorder %s4005_s14, %s4006_s11  ;;  %p4012_p9 = scmp.lt.s32.totalorder %s4010_s23, %s4006_s11 }
  0x8b   : > { %1769 = vmatpush.bf16.msra.mxu1 %v3189_v16  ;;  %v3627_v16 = vld [vmem:[#allocation5 + $0x144] sm:$0xf] }
  0x8c   : > { %4989 = vst [vmem:[#allocation20_spill] sm:$0xff] %v4404_v61  ;;  %1720 = vmatpush.bf16.msra.mxu0 %v3125_v13  ;;  %v3611_v13 = vld [vmem:[#allocation5 + $0xc4] sm:$0xf]  ;;  %p4008_p4 = pnand %p4007_p1, %p4190_p7  ;;  %p4013_p2 = por %p4012_p9, %p4011_p11 }
  0x8d   : > { %1676 = vmatpush.bf16.msrb.mxu3 %v3021_v63  ;;  %v4406_v63 = vor.u32 %v3537_v48, %v2816_v47  ;;  %v3117_v15 = vor.u32 %v3611_v13, %v3114_v14 }
  0x8e   : > { %p4009_p8 = pneg %p4008_p4 }
  0x8f   : > { %4990 = vst [vmem:[#allocation21_spill] sm:$0xff] %v4406_v63 }
  0x90   : > { %1349 = vmatmul.bf16.gmra.mxu0 %v4302_v42  ;;  %p4014_p10 = pnand %p4013_p2, %p4009_p8 }
  0x91   : > { %1398 = vmatmul.bf16.gmra.mxu1 %v4304_v43  ;;  %1721 = vmatpush.bf16.msra.mxu0 %v3117_v15 }
  0x92   : > { %1447 = vmatmul.bf16.gmra.mxu2 %v4306_v44 }
  0x93   : > { %1496 = vmatmul.bf16.gmra.mxu3 %v4308_v46 }
  0xa0   : > { %1354 = vmatmul.bf16.gmra.mxu0 %v4322_v0 }
  0xa1   : > { %1403 = vmatmul.bf16.gmra.mxu1 %v4324_v1 }
  0xa2   : > { %1452 = vmatmul.bf16.gmra.mxu2 %v4326_v2 }
  0xa3   : > { %1501 = vmatmul.bf16.gmra.mxu3 %v4328_v3 }
  0xb0   : > { %1359 = vmatmul.bf16.gmra.mxu0 %v4342_v55 }
  0xb1   : > { %1408 = vmatmul.bf16.gmra.mxu1 %v4344_v58 }
  0xb2   : > { %1457 = vmatmul.bf16.gmra.mxu2 %v4346_v59 }
  0xb3   : > { %1506 = vmatmul.bf16.gmra.mxu3 %v4348_v60 }
  0xc0   : > { %1364 = vmatmul.bf16.gmra.mxu0 %v4362_v51 }
  0xc1   : > { %1413 = vmatmul.bf16.gmra.mxu1 %v4364_v54 }
  0xc2   : > { %1462 = vmatmul.bf16.gmra.mxu2 %v4366_v56 }
  0xc3   : > { %1511 = vmatmul.bf16.gmra.mxu3 %v4368_v62  ;;  %v3274_v62 = vld [vmem:[#allocation5 + $0x208] sm:$0xf0] }
  0xd0   : > { %1369 = vmatmul.bf16.gmra.mxu0 %v4382_v22 }
  0xd1   : > { %1418 = vmatmul.bf16.gmra.mxu1 %v4384_v23 }
  0xd2   : > { %1467 = vmatmul.bf16.gmra.mxu2 %v4386_v28 }
  0xd3   : > { %1516 = vmatmul.bf16.gmra.mxu3 %v4388_v29 }
  0xdd   : > { %v1335_v57 = vpop.f32.mrf.mxu0 }
  0xde   : > { %v1336_v4 = vadd.f32 %v1335_v57, %v4394_v37  ;;  %v1384_v5 = vpop.f32.mrf.mxu1  ;;  %v4424_v57 = vor.u32 %v3540_v34, %v2838_v35  ;;  %v2864_v34 = vld [vmem:[%s4220_s28 + $0x80] sm:$0xf]  ;;  %v3550_v35 = vld [vmem:[%s4220_s28 + $0x98] sm:$0xf0] }
  0xe0   : > { %v1385_v10 = vadd.f32 %v1384_v5, %v1336_v4  ;;  %1530 = vmatmul.bf16.vlgmr.msrb.gmra.mxu0 %v4402_v52  ;;  %4991 = vst [vmem:[#allocation22_spill] sm:$0xff] %v4424_v57  ;;  %v4426_v4 = vor.u32 %v3544_v38, %v2844_v36  ;;  %v3547_v36 = vld [vmem:[%s4220_s28 + $0x84] sm:$0xf]  ;;  %v2866_v38 = vld [vmem:[%s4220_s28 + $0x9c] sm:$0xf0] }
  0xe1   : > { %1579 = vmatmul.bf16.vlgmr.msrb.gmra.mxu1 %v4404_v61  ;;  %v4446_v13 = vor.u32 %v3547_v36, %v2866_v38  ;;  %v3643_v61 = vld [vmem:[#allocation5 + $0x1c4] sm:$0xf] }
  0xe2   : > { %1628 = vmatmul.bf16.vlgmr.msrb.gmra.mxu2 %v4406_v63  ;;  %4992 = vst [vmem:[#allocation23_spill] sm:$0xff] %v4426_v4 }
  0xe3   : > { %1677 = vmatmul.bf16.vlgmr.msrb.gmra.mxu3 %v4242_v45  ;;  %4993 = vst [vmem:[#allocation24_spill] sm:$0xff] %v4446_v13 }
  0xe5   : > { %v1433_v17 = vpop.f32.mrf.mxu2  ;;  %v1337_v19 = vpop.f32.mrf.mxu0 }
  0xe6   : > { %v1434_v18 = vadd.f32 %v1433_v17, %v1385_v10  ;;  %v1482_v20 = vpop.f32.mrf.mxu3  ;;  %v1338_v21 = vadd.f32 %v1337_v19, %v4394_v37  ;;  %v1386_v30 = vpop.f32.mrf.mxu1  ;;  %v3178_v17 = vld [vmem:[#allocation5 + $0x148] sm:$0xf0] }
  0xe8   : > { %v4414_v31 = vadd.f32 %v1482_v20, %v1434_v18  ;;  %v1387_v45 = vadd.f32 %v1386_v30, %v1338_v21  ;;  %v3181_v18 = vor.u32 %v3627_v16, %v3178_v17 }
  0xea   : > { %1770 = vmatpush.bf16.msra.mxu1 %v3181_v18 }
  0xed   : > { %v1435_v39 = vpop.f32.mrf.mxu2  ;;  %v1340_v47 = vpop.f32.mrf.mxu0 }
  0xee   : > { %v1436_v41 = vadd.f32 %v1435_v39, %v1387_v45  ;;  %v1484_v48 = vpop.f32.mrf.mxu3  ;;  %v1341_v5 = vadd.f32 %v1340_v47, %v4394_v37  ;;  %v1389_v10 = vpop.f32.mrf.mxu1  ;;  %v2872_v39 = vld [vmem:[%s4220_s28 + $0x88] sm:$0xf] }
  0xf0   : > { %v4429_v11 = vadd.f32 %v1484_v48, %v1436_v41  ;;  %v1390_v12 = vadd.f32 %v1389_v10, %v1341_v5  ;;  %1535 = vmatmul.bf16.gmra.mxu0 %v4422_v40  ;;  %v3551_v41 = vld [vmem:[%s4220_s28 + $0xa0] sm:$0xf0]  ;;  %v4444_v48 = vor.u32 %v3550_v35, %v2864_v34 }
  0xf1   : > { %1584 = vmatmul.bf16.gmra.mxu1 %v4424_v57  ;;  %v4448_v14 = vor.u32 %v3551_v41, %v2872_v39  ;;  %v2956_v57 = vld [vmem:[%s4220_s28 + $0x130] sm:$0xf] }
  0xf2   : > { %1633 = vmatmul.bf16.gmra.mxu2 %v4426_v4 }
  0xf3   : > { %1682 = vmatmul.bf16.gmra.mxu3 %v4262_v6  ;;  %4994 = vst [vmem:[#allocation25_spill] sm:$0xff] %v4448_v14 }
  0xf5   : > { %v1438_v19 = vpop.f32.mrf.mxu2  ;;  %v1342_v21 = vpop.f32.mrf.mxu0 }
  0xf6   : > { %v1439_v20 = vadd.f32 %v1438_v19, %v1390_v12  ;;  %v1487_v30 = vpop.f32.mrf.mxu3  ;;  %v1343_v45 = vadd.f32 %v1342_v21, %v4394_v37  ;;  %v1391_v32 = vpop.f32.mrf.mxu1  ;;  %v3609_v19 = vld [vmem:[#allocation5 + $0xb4] sm:$0xf] }
  0xf8   : > { %v4436_v33 = vadd.f32 %v1487_v30, %v1439_v20  ;;  %v1392_v6 = vadd.f32 %v1391_v32, %v1343_v45  ;;  %v3106_v20 = vld [vmem:[#allocation5 + $0xb8] sm:$0xf0]  ;;  %v3625_v30 = vld [vmem:[#allocation5 + $0x134] sm:$0xf] }
  0xf9   : > { %v3109_v21 = vor.u32 %v3609_v19, %v3106_v20  ;;  %v3170_v45 = vld [vmem:[#allocation5 + $0x138] sm:$0xf0] }
  0xfa   : > { %v3173_v32 = vor.u32 %v3625_v30, %v3170_v45 }
  0xfb   : > { %1722 = vmatpush.bf16.msra.mxu0 %v3109_v21 }
  0xfc   : > { %1771 = vmatpush.bf16.msra.mxu1 %v3173_v32 }
  0xfd   : > { %v1440_v47 = vpop.f32.mrf.mxu2  ;;  %v1345_v10 = vpop.f32.mrf.mxu0 }
  0xfe   : > { %v1441_v5 = vadd.f32 %v1440_v47, %v1392_v6  ;;  %v1489_v12 = vpop.f32.mrf.mxu3  ;;  %v1346_v15 = vadd.f32 %v1345_v10, %v4394_v37  ;;  %v1394_v16 = vpop.f32.mrf.mxu1  ;;  %v2892_v47 = vld [vmem:[%s4220_s28 + $0xb8] sm:$0xf]  ;;  %v3554_v10 = vld [vmem:[%s4220_s28 + $0xbc] sm:$0xf] }
 0x100   : > { %v4451_v17 = vadd.f32 %v1489_v12, %v1441_v5  ;;  %v1395_v18 = vadd.f32 %v1394_v16, %v1346_v15  ;;  %1540 = vmatmul.bf16.gmra.mxu0 %v4444_v48  ;;  %v3557_v5 = vld [vmem:[%s4220_s28 + $0xd0] sm:$0xf0]  ;;  %v2894_v12 = vld [vmem:[%s4220_s28 + $0xd4] sm:$0xf0]  ;;  %v2900_v15 = vld [vmem:[%s4220_s28 + $0xc0] sm:$0xf] }
 0x101   : > { %1589 = vmatmul.bf16.gmra.mxu1 %v4446_v13  ;;  %v3558_v16 = vld [vmem:[%s4220_s28 + $0xd8] sm:$0xf0]  ;;  %v4466_v20 = vor.u32 %v3557_v5, %v2892_v47  ;;  %v4468_v45 = vor.u32 %v3554_v10, %v2894_v12  ;;  %v3623_v47 = vld [vmem:[#allocation5 + $0x124] sm:$0xf]  ;;  %v3162_v5 = vld [vmem:[#allocation5 + $0x128] sm:$0xf0] }
 0x102   : > { %1638 = vmatmul.bf16.gmra.mxu2 %v4448_v14  ;;  %v4470_v32 = vor.u32 %v3558_v16, %v2900_v15  ;;  %v3165_v10 = vor.u32 %v3623_v47, %v3162_v5  ;;  %v3266_v13 = vld [vmem:[#allocation5 + $0x1f8] sm:$0xf0] }
 0x103   : > { %1687 = vmatmul.bf16.gmra.mxu3 %v4282_v24  ;;  %4995 = vst [vmem:[#allocation26_spill] sm:$0xff] %v4468_v45 }
 0x104   : > { %4996 = vst [vmem:[#allocation27_spill] sm:$0xff] %v4470_v32  ;;  %1772 = vmatpush.bf16.msra.mxu1 %v3165_v10 }
 0x105   : > { %v1443_v6 = vpop.f32.mrf.mxu2  ;;  %v1347_v35 = vpop.f32.mrf.mxu0 }
 0x106   : > { %v1444_v34 = vadd.f32 %v1443_v6, %v1395_v18  ;;  %v1492_v36 = vpop.f32.mrf.mxu3  ;;  %v1348_v38 = vadd.f32 %v1347_v35, %v4394_v37  ;;  %v1396_v39 = vpop.f32.mrf.mxu1 }
 0x108   : > { %v4458_v41 = vadd.f32 %v1492_v36, %v1444_v34  ;;  %v1397_v24 = vadd.f32 %v1396_v39, %v1348_v38  ;;  %v3607_v38 = vld [vmem:[#allocation5 + $0xa4] sm:$0xf]  ;;  %v3098_v39 = vld [vmem:[#allocation5 + $0xa8] sm:$0xf0] }
 0x10d   : > { %v1445_v19 = vpop.f32.mrf.mxu2  ;;  %v1350_v18 = vpop.f32.mrf.mxu0 }
 0x10e   : > { %v1446_v21 = vadd.f32 %v1445_v19, %v1397_v24  ;;  %v1494_v30 = vpop.f32.mrf.mxu3  ;;  %v1351_v6 = vadd.f32 %v1350_v18, %v4394_v37  ;;  %v1399_v34 = vpop.f32.mrf.mxu1  ;;  %v3101_v24 = vor.u32 %v3607_v38, %v3098_v39  ;;  %v3561_v38 = vld [vmem:[%s4220_s28 + $0xf4] sm:$0xf]  ;;  %v2922_v39 = vld [vmem:[%s4220_s28 + $0x10c] sm:$0xf0] }
 0x10f   : > { %v4490_v14 = vor.u32 %v3561_v38, %v2922_v39  ;;  %v3665_v38 = vld [vmem:[#allocation5 + $0x274] sm:$0xf]  ;;  %v3154_v39 = vld [vmem:[#allocation5 + $0x118] sm:$0xf0] }
 0x110   : > { %v4473_v35 = vadd.f32 %v1494_v30, %v1446_v21  ;;  %v1400_v36 = vadd.f32 %v1399_v34, %v1351_v6  ;;  %1545 = vmatmul.bf16.gmra.mxu0 %v4466_v20  ;;  %v2920_v6 = vld [vmem:[%s4220_s28 + $0xf0] sm:$0xf]  ;;  %v3564_v34 = vld [vmem:[%s4220_s28 + $0x108] sm:$0xf0] }
 0x111   : > { %1594 = vmatmul.bf16.gmra.mxu1 %v4468_v45  ;;  %1723 = vmatpush.bf16.msra.mxu0 %v3101_v24  ;;  %v3565_v45 = vld [vmem:[%s4220_s28 + $0x110] sm:$0xf0]  ;;  %v4488_v5 = vor.u32 %v3564_v34, %v2920_v6  ;;  %4997 = vst [vmem:[#allocation28_spill] sm:$0xff] %v4490_v14  ;;  %v3090_v6 = vld [vmem:[#allocation5 + $0x98] sm:$0xf0] }
 0x112   : > { %1643 = vmatmul.bf16.gmra.mxu2 %v4470_v32  ;;  %v2928_v32 = vld [vmem:[%s4220_s28 + $0xf8] sm:$0xf] }
 0x113   : > { %1692 = vmatmul.bf16.gmra.mxu3 %v4302_v42  ;;  %v4492_v10 = vor.u32 %v3565_v45, %v2928_v32  ;;  %v3621_v32 = vld [vmem:[#allocation5 + $0x114] sm:$0xf] }
 0x115   : > { %v1448_v12 = vpop.f32.mrf.mxu2  ;;  %v1352_v16 = vpop.f32.mrf.mxu0  ;;  %4998 = vst [vmem:[#allocation29_spill] sm:$0xff] %v4492_v10 }
 0x116   : > { %v1449_v15 = vadd.f32 %v1448_v12, %v1400_v36  ;;  %v1497_v19 = vpop.f32.mrf.mxu3  ;;  %v1353_v21 = vadd.f32 %v1352_v16, %v4394_v37  ;;  %v1401_v18 = vpop.f32.mrf.mxu1 }
 0x118   : > { %v4480_v30 = vadd.f32 %v1497_v19, %v1449_v15  ;;  %v1402_v42 = vadd.f32 %v1401_v18, %v1353_v21  ;;  %v3649_v18 = vld [vmem:[#allocation5 + $0x1f4] sm:$0xf] }
 0x119   : > { %v3269_v34 = vor.u32 %v3649_v18, %v3266_v13  ;;  %v3322_v18 = vld [vmem:[#allocation5 + $0x268] sm:$0xf0] }
 0x11b   : > { %1816 = vmatpush.bf16.msra.mxu2 %v3269_v34 }
 0x11d   : > { %v1450_v47 = vpop.f32.mrf.mxu2  ;;  %v1355_v36 = vpop.f32.mrf.mxu0 }
 0x11e   : > { %v1451_v24 = vadd.f32 %v1450_v47, %v1402_v42  ;;  %v1499_v12 = vpop.f32.mrf.mxu3  ;;  %v1356_v15 = vadd.f32 %v1355_v36, %v4394_v37  ;;  %v1404_v16 = vpop.f32.mrf.mxu1  ;;  %v3605_v42 = vld [vmem:[#allocation5 + $0x94] sm:$0xf]  ;;  %v3330_v47 = vld [vmem:[#allocation5 + $0x278] sm:$0xf0] }
 0x11f   : > { %v3093_v45 = vor.u32 %v3605_v42, %v3090_v6  ;;  %v3333_v36 = vor.u32 %v3665_v38, %v3330_v47  ;;  %v3571_v47 = vld [vmem:[%s4220_s28 + $0x140] sm:$0xf0] }
 0x120   : > { %v4495_v19 = vadd.f32 %v1499_v12, %v1451_v24  ;;  %v1405_v21 = vadd.f32 %v1404_v16, %v1356_v15  ;;  %1550 = vmatmul.bf16.gmra.mxu0 %v4488_v5  ;;  %v3157_v24 = vor.u32 %v3621_v32, %v3154_v39  ;;  %v3647_v12 = vld [vmem:[#allocation5 + $0x1e4] sm:$0xf]  ;;  %v3258_v15 = vld [vmem:[#allocation5 + $0x1e8] sm:$0xf0]  ;;  %v2948_v39 = vld [vmem:[%s4220_s28 + $0x128] sm:$0xf] }
 0x121   : > { %1599 = vmatmul.bf16.gmra.mxu1 %v4490_v14  ;;  %1724 = vmatpush.bf16.msra.mxu0 %v3093_v45  ;;  %v3261_v14 = vor.u32 %v3647_v12, %v3258_v15  ;;  %v3645_v45 = vld [vmem:[#allocation5 + $0x1d4] sm:$0xf]  ;;  %v3314_v15 = vld [vmem:[#allocation5 + $0x258] sm:$0xf0] }
 0x122   : > { %1648 = vmatmul.bf16.gmra.mxu2 %v4492_v10  ;;  %1773 = vmatpush.bf16.msra.mxu1 %v3157_v24  ;;  %v3568_v24 = vld [vmem:[%s4220_s28 + $0x12c] sm:$0xf] }
 0x123   : > { %1697 = vmatmul.bf16.gmra.mxu3 %v4322_v0  ;;  %v3663_v0 = vld [vmem:[#allocation5 + $0x264] sm:$0xf]  ;;  %1817 = vmatpush.bf16.msra.mxu2 %v3261_v14 }
 0x124   : > { %1865 = vmatpush.bf16.msra.mxu3 %v3333_v36  ;;  %v3325_v34 = vor.u32 %v3663_v0, %v3322_v18  ;;  %v3661_v36 = vld [vmem:[#allocation5 + $0x254] sm:$0xf]  ;;  %v3242_v0 = vld [vmem:[#allocation5 + $0x1c8] sm:$0xf0] }
 0x125   : > { %v1453_v16 = vpop.f32.mrf.mxu2  ;;  %v1357_v4 = vpop.f32.mrf.mxu0  ;;  %v3317_v63 = vor.u32 %v3661_v36, %v3314_v15  ;;  %v3245_v14 = vor.u32 %v3643_v61, %v3242_v0  ;;  %v3641_v61 = vld [vmem:[#allocation5 + $0x1b4] sm:$0xf]  ;;  %v3146_v0 = vld [vmem:[#allocation5 + $0x108] sm:$0xf0] }
 0x126   : > { %v1454_v10 = vadd.f32 %v1453_v16, %v1405_v21  ;;  %v1502_v13 = vpop.f32.mrf.mxu3  ;;  %v1358_v42 = vadd.f32 %v1357_v4, %v4394_v37  ;;  %v1406_v6 = vpop.f32.mrf.mxu1  ;;  %v3250_v21 = vld [vmem:[#allocation5 + $0x1d8] sm:$0xf0]  ;;  %v2950_v16 = vld [vmem:[%s4220_s28 + $0x144] sm:$0xf0]  ;;  %v3572_v4 = vld [vmem:[%s4220_s28 + $0x148] sm:$0xf0] }
 0x127   : > { %v3253_v12 = vor.u32 %v3645_v45, %v3250_v21  ;;  %v4512_v29 = vor.u32 %v3568_v24, %v2950_v16  ;;  %v4514_v45 = vor.u32 %v3572_v4, %v2956_v57  ;;  %v3306_v21 = vld [vmem:[#allocation5 + $0x248] sm:$0xf0]  ;;  %v3603_v57 = vld [vmem:[#allocation5 + $0x84] sm:$0xf]  ;;  %v3657_v24 = vld [vmem:[#allocation5 + $0x234] sm:$0xf] }
 0x128   : > { %v4502_v38 = vadd.f32 %v1502_v13, %v1454_v10  ;;  %v1407_v32 = vadd.f32 %v1406_v6, %v1358_v42  ;;  %1866 = vmatpush.bf16.msra.mxu3 %v3325_v34  ;;  %v4510_v13 = vor.u32 %v3571_v47, %v2948_v39  ;;  %v3659_v34 = vld [vmem:[#allocation5 + $0x244] sm:$0xf] }
 0x129   : > { %1818 = vmatpush.bf16.msra.mxu2 %v3253_v12  ;;  %4999 = vst [vmem:[#allocation30_spill] sm:$0xff] %v4512_v29  ;;  %v3309_v15 = vor.u32 %v3659_v34, %v3306_v21  ;;  %v3619_v4 = vld [vmem:[#allocation5 + $0x104] sm:$0xf] }
 0x12a   : > { %5000 = vst [vmem:[#allocation31_spill] sm:$0xff] %v4514_v45 }
 0x12c   : > { %1867 = vmatpush.bf16.msra.mxu3 %v3317_v63  ;;  %v3082_v63 = vld [vmem:[#allocation5 + $0x88] sm:$0xf0] }
 0x12d   : > { %v1455_v10 = vpop.f32.mrf.mxu2  ;;  %v1360_v42 = vpop.f32.mrf.mxu0  ;;  %1819 = vmatpush.bf16.msra.mxu2 %v3245_v14  ;;  %v3085_v16 = vor.u32 %v3603_v57, %v3082_v63 }
 0x12e   : > { %v1456_v18 = vadd.f32 %v1455_v10, %v1407_v32  ;;  %v1504_v6 = vpop.f32.mrf.mxu3  ;;  %v1361_v28 = vadd.f32 %v1360_v42, %v4394_v37  ;;  %v1409_v36 = vpop.f32.mrf.mxu1  ;;  %v3234_v32 = vld [vmem:[#allocation5 + $0x1b8] sm:$0xf0]  ;;  %v3226_v42 = vld [vmem:[#allocation5 + $0x1a8] sm:$0xf0] }
 0x12f   : > { %v3237_v47 = vor.u32 %v3641_v61, %v3234_v32  ;;  %v3298_v10 = vld [vmem:[#allocation5 + $0x238] sm:$0xf0]  ;;  %1725 = vmatpush.bf16.msra.mxu0 %v3085_v16  ;;  %v3290_v32 = vld [vmem:[#allocation5 + $0x228] sm:$0xf0] }
 0x130   : > { %v4517_v12 = vadd.f32 %v1504_v6, %v1456_v18  ;;  %v1410_v39 = vadd.f32 %v1409_v36, %v1361_v28  ;;  %1555 = vmatmul.bf16.gmra.mxu0 %v4510_v13  ;;  %1868 = vmatpush.bf16.msra.mxu3 %v3309_v15  ;;  %v3149_v28 = vor.u32 %v3619_v4, %v3146_v0  ;;  %v3639_v18 = vld [vmem:[#allocation5 + $0x1a4] sm:$0xf]  ;;  %v2976_v4 = vld [vmem:[%s4220_s28 + $0x160] sm:$0xf]  ;;  %v3578_v0 = vld [vmem:[%s4220_s28 + $0x178] sm:$0xf0] }
 0x131   : > { %1604 = vmatmul.bf16.gmra.mxu1 %v4512_v29  ;;  %1820 = vmatpush.bf16.msra.mxu2 %v3237_v47  ;;  %v3301_v14 = vor.u32 %v3657_v24, %v3298_v10  ;;  %v3229_v34 = vor.u32 %v3639_v18, %v3226_v42  ;;  %v3637_v24 = vld [vmem:[#allocation5 + $0x194] sm:$0xf]  ;;  %v3282_v42 = vld [vmem:[#allocation5 + $0x218] sm:$0xf0] }
 0x132   : > { %1653 = vmatmul.bf16.gmra.mxu2 %v4514_v45  ;;  %1774 = vmatpush.bf16.msra.mxu1 %v3149_v28  ;;  %v3575_v28 = vld [vmem:[%s4220_s28 + $0x164] sm:$0xf]  ;;  %v3653_v18 = vld [vmem:[#allocation5 + $0x214] sm:$0xf]  ;;  %v2984_v45 = vld [vmem:[%s4220_s28 + $0x168] sm:$0xf] }
 0x133   : > { %1702 = vmatmul.bf16.gmra.mxu3 %v4342_v55  ;;  %v3655_v55 = vld [vmem:[#allocation5 + $0x224] sm:$0xf]  ;;  %v3285_v29 = vor.u32 %v3653_v18, %v3282_v42  ;;  %v3458_v42 = vld [vmem:[#allocation5 + $0x378] sm:$0xf0] }
 0x134   : > { %1869 = vmatpush.bf16.msra.mxu3 %v3301_v14  ;;  %v3293_v47 = vor.u32 %v3655_v55, %v3290_v32 }
 0x135   : > { %v1458_v6 = vpop.f32.mrf.mxu2  ;;  %v1362_v36 = vpop.f32.mrf.mxu0  ;;  %1821 = vmatpush.bf16.msra.mxu2 %v3229_v34  ;;  %v4532_v34 = vor.u32 %v3578_v0, %v2976_v4 }
 0x136   : > { %v1459_v21 = vadd.f32 %v1458_v6, %v1410_v39  ;;  %v1507_v61 = vpop.f32.mrf.mxu3  ;;  %v1363_v15 = vadd.f32 %v1362_v36, %v4394_v37  ;;  %v1411_v57 = vpop.f32.mrf.mxu1  ;;  %v3218_v39 = vld [vmem:[#allocation5 + $0x198] sm:$0xf0]  ;;  %v2978_v6 = vld [vmem:[%s4220_s28 + $0x17c] sm:$0xf0]  ;;  %v3579_v36 = vld [vmem:[%s4220_s28 + $0x180] sm:$0xf0] }
 0x137   : > { %v3221_v10 = vor.u32 %v3637_v24, %v3218_v39  ;;  %v4534_v23 = vor.u32 %v3575_v28, %v2978_v6  ;;  %v4536_v24 = vor.u32 %v3579_v36, %v2984_v45  ;;  %v3651_v39 = vld [vmem:[#allocation5 + $0x204] sm:$0xf]  ;;  %v3394_v45 = vld [vmem:[#allocation5 + $0x2f8] sm:$0xf0]  ;;  %v3697_v28 = vld [vmem:[#allocation5 + $0x374] sm:$0xf] }
 0x138   : > { %v4524_v63 = vadd.f32 %v1507_v61, %v1459_v21  ;;  %v1412_v16 = vadd.f32 %v1411_v57, %v1363_v15  ;;  %1870 = vmatpush.bf16.msra.mxu3 %v3293_v47  ;;  %v3635_v21 = vld [vmem:[#allocation5 + $0x184] sm:$0xf]  ;;  %v3210_v61 = vld [vmem:[#allocation5 + $0x188] sm:$0xf0]  ;;  %v3277_v18 = vor.u32 %v3651_v39, %v3274_v62  ;;  %v3012_v39 = vld [vmem:[%s4220_s28 + $0x1a0] sm:$0xf] }
 0x139   : > { %1822 = vmatpush.bf16.msra.mxu2 %v3221_v10  ;;  %v3213_v55 = vor.u32 %v3635_v21, %v3210_v61 }
 0x13c   : > { %1871 = vmatpush.bf16.msra.mxu3 %v3285_v29 }
 0x13d   : > { %v1460_v14 = vpop.f32.mrf.mxu2  ;;  %v1365_v15 = vpop.f32.mrf.mxu0  ;;  %1823 = vmatpush.bf16.msra.mxu2 %v3213_v55  ;;  %v3004_v55 = vld [vmem:[%s4220_s28 + $0x198] sm:$0xf] }
 0x13e   : > { %v1461_v32 = vadd.f32 %v1460_v14, %v1412_v16  ;;  %v1509_v57 = vpop.f32.mrf.mxu3  ;;  %v1366_v56 = vadd.f32 %v1365_v15, %v4394_v37  ;;  %v1414_v47 = vpop.f32.mrf.mxu1  ;;  %v3681_v16 = vld [vmem:[#allocation5 + $0x2f4] sm:$0xf]  ;;  %v3582_v15 = vld [vmem:[%s4220_s28 + $0x19c] sm:$0xf] }
 0x13f   : > { %v3397_v0 = vor.u32 %v3681_v16, %v3394_v45 }
 0x140   : > { %v4539_v10 = vadd.f32 %v1509_v57, %v1461_v32  ;;  %v1415_v4 = vadd.f32 %v1414_v47, %v1366_v56  ;;  %1560 = vmatmul.bf16.gmra.mxu0 %v4532_v34  ;;  %1872 = vmatpush.bf16.msra.mxu3 %v3277_v18  ;;  %v3461_v56 = vor.u32 %v3697_v28, %v3458_v42  ;;  %v3585_v32 = vld [vmem:[%s4220_s28 + $0x1b0] sm:$0xf0]  ;;  %v3006_v57 = vld [vmem:[%s4220_s28 + $0x1b4] sm:$0xf0]  ;;  %v3586_v47 = vld [vmem:[%s4220_s28 + $0x1b8] sm:$0xf0] }
 0x141   : > { %1609 = vmatmul.bf16.gmra.mxu1 %v4534_v23  ;;  %1914 = vmatpush.bf16.msrb.mxu0 %v3397_v0  ;;  %v4554_v16 = vor.u32 %v3585_v32, %v3004_v55  ;;  %v4556_v28 = vor.u32 %v3582_v15, %v3006_v57  ;;  %v4558_v42 = vor.u32 %v3586_v47, %v3012_v39  ;;  %v3450_v55 = vld [vmem:[#allocation5 + $0x368] sm:$0xf0] }
 0x142   : > { %1658 = vmatmul.bf16.gmra.mxu2 %v4536_v24  ;;  %1963 = vmatpush.bf16.msrb.mxu1 %v3461_v56 }
 0x143   : > { %1707 = vmatmul.bf16.gmra.mxu3 %v4362_v51  ;;  %5001 = vst [vmem:[#allocation32_spill] sm:$0xff] %v4558_v42 }
 0x145   : > { %v1463_v62 = vpop.f32.mrf.mxu2  ;;  %v1367_v6 = vpop.f32.mrf.mxu0 }
 0x146   : > { %v1464_v29 = vadd.f32 %v1463_v62, %v1415_v4  ;;  %v1512_v36 = vpop.f32.mrf.mxu3  ;;  %v1368_v21 = vadd.f32 %v1367_v6, %v4394_v37  ;;  %v1416_v51 = vpop.f32.mrf.mxu1 }
 0x148   : > { %v4546_v61 = vadd.f32 %v1512_v36, %v1464_v29  ;;  %v1417_v14 = vadd.f32 %v1416_v51, %v1368_v21  ;;  %v3679_v36 = vld [vmem:[#allocation5 + $0x2e4] sm:$0xf]  ;;  %v3386_v21 = vld [vmem:[#allocation5 + $0x2e8] sm:$0xf0] }
 0x149   : > { %v3389_v51 = vor.u32 %v3679_v36, %v3386_v21 }
 0x14b   : > { %1915 = vmatpush.bf16.msrb.mxu0 %v3389_v51 }
 0x14d   : > { %v1465_v18 = vpop.f32.mrf.mxu2  ;;  %v1370_v4 = vpop.f32.mrf.mxu0 }
 0x14e   : > { %v1466_v45 = vadd.f32 %v1465_v18, %v1417_v14  ;;  %v1514_v0 = vpop.f32.mrf.mxu3  ;;  %v1371_v56 = vadd.f32 %v1370_v4, %v4394_v37  ;;  %v1419_v62 = vpop.f32.mrf.mxu1  ;;  %v3695_v14 = vld [vmem:[#allocation5 + $0x364] sm:$0xf] }
 0x14f   : > { %v3453_v32 = vor.u32 %v3695_v14, %v3450_v55 }
 0x150   : > { %v4561_v29 = vadd.f32 %v1514_v0, %v1466_v45  ;;  %v1420_v6 = vadd.f32 %v1419_v62, %v1371_v56  ;;  %1565 = vmatmul.bf16.gmra.mxu0 %v4554_v16 }
 0x151   : > { %1614 = vmatmul.bf16.gmra.mxu1 %v4556_v28 }
 0x152   : > { %1663 = vmatmul.bf16.gmra.mxu2 %v4558_v42  ;;  %1964 = vmatpush.bf16.msrb.mxu1 %v3453_v32  ;;  %v3693_v32 = vld [vmem:[#allocation5 + $0x354] sm:$0xf] }
 0x153   : > { %1712 = vmatmul.bf16.gmra.mxu3 %v4382_v22 }
 0x155   : > { %v1468_v15 = vpop.f32.mrf.mxu2  ;;  %v1372_v39 = vpop.f32.mrf.mxu0 }
 0x156   : > { %v1469_v57 = vadd.f32 %v1468_v15, %v1420_v6  ;;  %v1517_v47 = vpop.f32.mrf.mxu3  ;;  %v1373_v18 = vadd.f32 %v1372_v39, %v4394_v37  ;;  %v1421_v45 = vpop.f32.mrf.mxu1  ;;  %v3677_v37 = vld [vmem:[#allocation5 + $0x2d4] sm:$0xf]  ;;  %v3378_v6 = vld [vmem:[#allocation5 + $0x2d8] sm:$0xf0] }
 0x157   : > { %v3381_v55 = vor.u32 %v3677_v37, %v3378_v6  ;;  %v3442_v15 = vld [vmem:[#allocation5 + $0x358] sm:$0xf0]  ;;  %v3691_v37 = vld [vmem:[#allocation5 + $0x344] sm:$0xf]  ;;  %v3434_v6 = vld [vmem:[#allocation5 + $0x348] sm:$0xf0] }
 0x158   : > { %v4568_v4 = vadd.f32 %v1517_v47, %v1469_v57  ;;  %v1422_v0 = vadd.f32 %v1421_v45, %v1373_v18  ;;  %v3445_v57 = vor.u32 %v3693_v32, %v3442_v15 }
 0x159   : > { %1916 = vmatpush.bf16.msrb.mxu0 %v3381_v55 }
 0x15a   : > { %1965 = vmatpush.bf16.msrb.mxu1 %v3445_v57 }
 0x15d   : > { %v1470_v56 = vpop.f32.mrf.mxu2  ;;  %v1531_v22 = vpop.f32.mrf.mxu0 }
 0x15e   : > { %v1471_v62 = vadd.f32 %v1470_v56, %v1422_v0  ;;  %v1519_v42 = vpop.f32.mrf.mxu3  ;;  %v1532_v36 = vadd.f32 %v1531_v22, %v4414_v31  ;;  %v1580_v21 = vpop.f32.mrf.mxu1 }
 0x160   : > { %v4571_v14 = vadd.f32 %v1519_v42, %v1471_v62  ;;  %v1581_v51 = vadd.f32 %v1580_v21, %v1532_v36  ;;  %1726 = vmatmul.bf16.vlgmr.msra.gmra.mxu0 %v4244_v49  ;;  %v3370_v21 = vld [vmem:[#allocation5 + $0x2c8] sm:$0xf0] }
 0x161   : > { %1775 = vmatmul.bf16.vlgmr.msra.gmra.mxu1 %v4246_v50 }
 0x162   : > { %1824 = vmatmul.bf16.vlgmr.msra.gmra.mxu2 %v4248_v53 }
 0x163   : > { %1873 = vmatmul.bf16.vlgmr.msra.gmra.mxu3 %v4402_v52 }
 0x165   : > { %v1629_v39 = vpop.f32.mrf.mxu2  ;;  %v1533_v42 = vpop.f32.mrf.mxu0 }
 0x166   : > { %v1630_v31 = vadd.f32 %v1629_v39, %v1581_v51  ;;  %v1534_v47 = vadd.f32 %v1533_v42, %v4429_v11  ;;  %v1582_v49 = vpop.f32.mrf.mxu1  ;;  %v3675_v11 = vld [vmem:[#allocation5 + $0x2c4] sm:$0xf] }
 0x167   : > { %v3373_v51 = vor.u32 %v3675_v11, %v3370_v21 }
 0x168   : > { %v1583_v18 = vadd.f32 %v1582_v49, %v1534_v47  ;;  %v2012_v52 = vmax.f32 %v1630_v31, 0.0 }
 0x169   : > { %1917 = vmatpush.bf16.msrb.mxu0 %v3373_v51 }
 0x16d   : > { %v1631_v50 = vpop.f32.mrf.mxu2  ;;  %v1536_v53 = vpop.f32.mrf.mxu0 }
 0x16e   : > { %v1632_v45 = vadd.f32 %v1631_v50, %v1583_v18  ;;  %v1537_v0 = vadd.f32 %v1536_v53, %v4436_v33  ;;  %v1585_v56 = vpop.f32.mrf.mxu1  ;;  %v3437_v33 = vor.u32 %v3691_v37, %v3434_v6  ;;  %v3673_v50 = vld [vmem:[#allocation5 + $0x2b4] sm:$0xf] }
 0x170   : > { %v2014_v62 = vmax.f32 %v1632_v45, 0.0  ;;  %v1586_v22 = vadd.f32 %v1585_v56, %v1537_v0  ;;  %1731 = vmatmul.bf16.gmra.mxu0 %v4264_v7  ;;  %1966 = vmatpush.bf16.msrb.mxu1 %v3437_v33  ;;  %v3362_v45 = vld [vmem:[#allocation5 + $0x2b8] sm:$0xf0]  ;;  %v3689_v0 = vld [vmem:[#allocation5 + $0x334] sm:$0xf] }
 0x171   : > { %1780 = vmatmul.bf16.gmra.mxu1 %v4266_v8  ;;  %v3365_v53 = vor.u32 %v3673_v50, %v3362_v45  ;;  %v3426_v56 = vld [vmem:[#allocation5 + $0x338] sm:$0xf0] }
 0x172   : > { %v4580_v36 = vpack.c.bf16 %v2014_v62, %v2012_v52  ;;  %1829 = vmatmul.bf16.gmra.mxu2 %v4268_v9 }
 0x173   : > { %1878 = vmatmul.bf16.gmra.mxu3 %v4422_v40  ;;  %1918 = vmatpush.bf16.msrb.mxu0 %v3365_v53 }
 0x175   : > { %v1634_v55 = vpop.f32.mrf.mxu2  ;;  %v1538_v15 = vpop.f32.mrf.mxu0 }
 0x176   : > { %v1635_v32 = vadd.f32 %v1634_v55, %v1586_v22  ;;  %v1539_v7 = vadd.f32 %v1538_v15, %v4451_v17  ;;  %v1587_v57 = vpop.f32.mrf.mxu1  ;;  %v3354_v15 = vld [vmem:[#allocation5 + $0x2a8] sm:$0xf0] }
 0x178   : > { %v1588_v39 = vadd.f32 %v1587_v57, %v1539_v7  ;;  %v2016_v40 = vmax.f32 %v1635_v32, 0.0 }
 0x17d   : > { %v1636_v8 = vpop.f32.mrf.mxu2  ;;  %v1541_v9 = vpop.f32.mrf.mxu0 }
 0x17e   : > { %v1637_v31 = vadd.f32 %v1636_v8, %v1588_v39  ;;  %v1542_v42 = vadd.f32 %v1541_v9, %v4458_v41  ;;  %v1590_v47 = vpop.f32.mrf.mxu1  ;;  %v3429_v41 = vor.u32 %v3689_v0, %v3426_v56  ;;  %v3687_v39 = vld [vmem:[#allocation5 + $0x324] sm:$0xf]  ;;  %v3418_v8 = vld [vmem:[#allocation5 + $0x328] sm:$0xf0] }
 0x180   : > { %v2018_v49 = vmax.f32 %v1637_v31, 0.0  ;;  %v1591_v18 = vadd.f32 %v1590_v47, %v1542_v42  ;;  %1736 = vmatmul.bf16.gmra.mxu0 %v4284_v25  ;;  %1967 = vmatpush.bf16.msrb.mxu1 %v3429_v41  ;;  %v3706_v41 = vld [vmem:[#allocation8 + $0x38] sm:$0xff] }
 0x181   : > { %1785 = vmatmul.bf16.gmra.mxu1 %v4286_v26  ;;  %2192 = vmatpush.bf16.msrb.mxu2 %v3706_v41 }
 0x182   : > { %1834 = vmatmul.bf16.gmra.mxu2 %v4288_v27  ;;  %v4590_v17 = vpack.c.bf16 %v2018_v49, %v2016_v40  ;;  %v4594_v27 = vpop.f32.mrf.mxu3 }
 0x183   : > { %1883 = vmatmul.bf16.gmra.mxu3 %v4444_v48 }
 0x185   : > { %v1639_v52 = vpop.f32.mrf.mxu2  ;;  %v1543_v22 = vpop.f32.mrf.mxu0 }
 0x186   : > { %v1640_v62 = vadd.f32 %v1639_v52, %v1591_v18  ;;  %v1544_v25 = vadd.f32 %v1543_v22, %v4473_v35  ;;  %v1592_v26 = vpop.f32.mrf.mxu1  ;;  %v3671_v35 = vld [vmem:[#allocation5 + $0x2a4] sm:$0xf]  ;;  %v3346_v52 = vld [vmem:[#allocation5 + $0x298] sm:$0xf0]  ;;  %v3685_v22 = vld [vmem:[#allocation5 + $0x314] sm:$0xf] }
 0x187   : > { %v3357_v57 = vor.u32 %v3671_v35, %v3354_v15 }
 0x188   : > { %v1593_v11 = vadd.f32 %v1592_v26, %v1544_v25  ;;  %v2020_v33 = vmax.f32 %v1640_v62, 0.0  ;;  %v3410_v25 = vld [vmem:[#allocation5 + $0x318] sm:$0xf0] }
 0x189   : > { %1919 = vmatpush.bf16.msrb.mxu0 %v3357_v57  ;;  %v3413_v26 = vor.u32 %v3685_v22, %v3410_v25 }
 0x18d   : > { %v1641_v21 = vpop.f32.mrf.mxu2  ;;  %v1546_v37 = vpop.f32.mrf.mxu0 }
 0x18e   : > { %v1642_v51 = vadd.f32 %v1641_v21, %v1593_v11  ;;  %v1547_v48 = vadd.f32 %v1546_v37, %v4480_v30  ;;  %v1595_v6 = vpop.f32.mrf.mxu1  ;;  %v3421_v30 = vor.u32 %v3687_v39, %v3418_v8  ;;  %v3705_v21 = vld [vmem:[#allocation8 + $0x30] sm:$0xff] }
 0x18f   : > { %2193 = vmatpush.bf16.msrb.mxu2 %v3705_v21 }
 0x190   : > { %v2022_v55 = vmax.f32 %v1642_v51, 0.0  ;;  %v1596_v32 = vadd.f32 %v1595_v6, %v1547_v48  ;;  %1741 = vmatmul.bf16.gmra.mxu0 %v4304_v43  ;;  %1968 = vmatpush.bf16.msrb.mxu1 %v3421_v30  ;;  %v4603_v43 = vpop.f32.mrf.mxu3  ;;  %v3704_v48 = vld [vmem:[#allocation8 + $0x28] sm:$0xff]  ;;  %v3667_v30 = vld [vmem:[#allocation5 + $0x284] sm:$0xf] }
 0x191   : > { %1790 = vmatmul.bf16.gmra.mxu1 %v4306_v44 }
 0x192   : > { %1839 = vmatmul.bf16.gmra.mxu2 %v4308_v46  ;;  %v4600_v7 = vpack.c.bf16 %v2022_v55, %v2020_v33  ;;  %v3703_v33 = vld [vmem:[#allocation8 + $0x20] sm:$0xff] }
 0x193   : > { %1888 = vmatmul.bf16.gmra.mxu3 %v4466_v20  ;;  %2194 = vmatpush.bf16.msrb.mxu2 %v3704_v48 }
 0x194   : > { %1969 = vmatpush.bf16.msrb.mxu1 %v3413_v26  ;;  %v5003_v26 = vld [vmem:[#allocation16_spill] sm:$0xff] }
 0x195   : > { %v1644_v31 = vpop.f32.mrf.mxu2  ;;  %v1548_v42 = vpop.f32.mrf.mxu0 }
 0x196   : > { %v1645_v9 = vadd.f32 %v1644_v31, %v1596_v32  ;;  %v1549_v44 = vadd.f32 %v1548_v42, %v4495_v19  ;;  %v1597_v46 = vpop.f32.mrf.mxu1  ;;  %v3669_v19 = vld [vmem:[#allocation5 + $0x294] sm:$0xf]  ;;  %v3338_v31 = vld [vmem:[#allocation5 + $0x288] sm:$0xf0] }
 0x197   : > { %2195 = vmatpush.bf16.msrb.mxu2 %v3703_v33  ;;  %v3341_v42 = vor.u32 %v3667_v30, %v3338_v31 }
 0x198   : > { %v1598_v47 = vadd.f32 %v1597_v46, %v1549_v44  ;;  %v2024_v45 = vmax.f32 %v1645_v9, 0.0  ;;  %v4607_v0 = vpop.f32.mrf.mxu3  ;;  %v3402_v44 = vld [vmem:[#allocation5 + $0x308] sm:$0xf0] }
 0x19d   : > { %v1646_v40 = vpop.f32.mrf.mxu2  ;;  %v1551_v18 = vpop.f32.mrf.mxu0 }
 0x19e   : > { %v1647_v49 = vadd.f32 %v1646_v40, %v1598_v47  ;;  %v1552_v20 = vadd.f32 %v1551_v18, %v4502_v38  ;;  %v1600_v50 = vpop.f32.mrf.mxu1  ;;  %v3349_v38 = vor.u32 %v3669_v19, %v3346_v52 }
 0x1a0   : > { %v2026_v53 = vmax.f32 %v1647_v49, 0.0  ;;  %v1601_v56 = vadd.f32 %v1600_v50, %v1552_v20  ;;  %1746 = vmatmul.bf16.gmra.mxu0 %v4324_v1  ;;  %v4616_v6 = vpop.f32.mrf.mxu3  ;;  %v3700_v50 = vld [vmem:[#allocation8 + $0x8] sm:$0xff] }
 0x1a1   : > { %1795 = vmatmul.bf16.gmra.mxu1 %v4326_v2  ;;  %1920 = vmatpush.bf16.msrb.mxu0 %v3349_v38 }
 0x1a2   : > { %1844 = vmatmul.bf16.gmra.mxu2 %v4328_v3  ;;  %v4612_v62 = vpack.c.bf16 %v2026_v53, %v2024_v45  ;;  %v3699_v45 = vld [vmem:[#allocation8] sm:$0xff] }
 0x1a3   : > { %1893 = vmatmul.bf16.gmra.mxu3 %v4488_v5 }
 0x1a5   : > { %v1649_v11 = vpop.f32.mrf.mxu2  ;;  %v1553_v51 = vpop.f32.mrf.mxu0  ;;  %1921 = vmatpush.bf16.msrb.mxu0 %v3341_v42  ;;  %v3869_v42 = vld [vmem:[#allocation7] sm:$0x3] }
 0x1a6   : > { %v1650_v1 = vadd.f32 %v1649_v11, %v1601_v56  ;;  %v1554_v2 = vadd.f32 %v1553_v51, %v4517_v12  ;;  %v1602_v3 = vpop.f32.mrf.mxu1  ;;  %v3702_v12 = vld [vmem:[#allocation8 + $0x18] sm:$0xff] }
 0x1a7   : > { %2196 = vmatpush.bf16.msrb.mxu2 %v3702_v12 }
 0x1a8   : > { %v1603_v37 = vadd.f32 %v1602_v3, %v1554_v2  ;;  %v2028_v57 = vmax.f32 %v1650_v1, 0.0  ;;  %v4625_v47 = vpop.f32.mrf.mxu3 }
 0x1ad   : > { %v1651_v5 = vpop.f32.mrf.mxu2  ;;  %v1556_v32 = vpop.f32.mrf.mxu0 }
 0x1ae   : > { %v1652_v55 = vadd.f32 %v1651_v5, %v1603_v37  ;;  %v1557_v35 = vadd.f32 %v1556_v32, %v4524_v63  ;;  %v1605_v15 = vpop.f32.mrf.mxu1  ;;  %v3683_v63 = vld [vmem:[#allocation5 + $0x304] sm:$0xf] }
 0x1af   : > { %v3405_v46 = vor.u32 %v3683_v63, %v3402_v44  ;;  %v4649_v63 = vperm.slane %v3869_v42, 1 }
 0x1b0   : > { %v2030_v39 = vmax.f32 %v1652_v55, 0.0  ;;  %v1606_v8 = vadd.f32 %v1605_v15, %v1557_v35  ;;  %1751 = vmatmul.bf16.gmra.mxu0 %v4344_v58  ;;  %v3701_v58 = vld [vmem:[#allocation8 + $0x10] sm:$0xff]  ;;  %v4628_v41 = vpop.f32.mrf.mxu3 }
 0x1b1   : > { %1800 = vmatmul.bf16.gmra.mxu1 %v4346_v59  ;;  %2197 = vmatpush.bf16.msrb.mxu2 %v3701_v58  ;;  %v1679_v58 = vadd.f32 %v4594_v27, %v4649_v63  ;;  %v1681_v27 = vadd.f32 %v4603_v43, %v4649_v63  ;;  %v3712_v43 = vld [vmem:[#allocation8 + $0x68] sm:$0xff] }
 0x1b2   : > { %1849 = vmatmul.bf16.gmra.mxu2 %v4348_v60  ;;  %v4622_v9 = vpack.c.bf16 %v2030_v39, %v2028_v57  ;;  %1970 = vmatpush.bf16.msrb.mxu1 %v3405_v46  ;;  %v5004_v57 = vld [vmem:[#allocation17_spill] sm:$0xff]  ;;  %v5005_v39 = vld [vmem:[#allocation18_spill] sm:$0xff] }
 0x1b3   : > { %1898 = vmatmul.bf16.gmra.mxu3 %v4510_v13 }
 0x1b5   : > { %v1654_v40 = vpop.f32.mrf.mxu2  ;;  %v1558_v59 = vpop.f32.mrf.mxu0  ;;  %2198 = vmatpush.bf16.msrb.mxu2 %v3700_v50 }
 0x1b6   : > { %v1655_v49 = vadd.f32 %v1654_v40, %v1606_v8  ;;  %v1559_v60 = vadd.f32 %v1558_v59, %v4539_v10  ;;  %v1607_v18 = vpop.f32.mrf.mxu1  ;;  %v5002_v10 = vld [vmem:[#allocation15_spill] sm:$0xff] }
 0x1b7   : > { %v5006_v8 = vld [vmem:[#allocation19_spill] sm:$0xff] }
 0x1b8   : > { %v1608_v20 = vadd.f32 %v1607_v18, %v1559_v60  ;;  %v2032_v38 = vmax.f32 %v1655_v49, 0.0  ;;  %v4638_v3 = vpop.f32.mrf.mxu3 }
 0x1b9   : > { %2199 = vmatpush.bf16.msrb.mxu2 %v3699_v45  ;;  %v5007_v45 = vld [vmem:[#allocation20_spill] sm:$0xff] }
 0x1bd   : > { %v1656_v13 = vpop.f32.mrf.mxu2  ;;  %v1561_v56 = vpop.f32.mrf.mxu0 }
 0x1be   : > { %v1657_v53 = vadd.f32 %v1656_v13, %v1608_v20  ;;  %v1562_v19 = vadd.f32 %v1561_v56, %v4546_v61  ;;  %v1610_v52 = vpop.f32.mrf.mxu1  ;;  %v5008_v56 = vld [vmem:[#allocation21_spill] sm:$0xff] }
 0x1c0   : > { %v2034_v22 = vmax.f32 %v1657_v53, 0.0  ;;  %v1611_v25 = vadd.f32 %v1610_v52, %v1562_v19  ;;  %1756 = vmatmul.bf16.gmra.mxu0 %v4364_v54  ;;  %v4646_v12 = vpop.f32.mrf.mxu3  ;;  %v3713_v53 = vld [vmem:[#allocation8 + $0x70] sm:$0xff] }
 0x1c1   : > { %1805 = vmatmul.bf16.gmra.mxu1 %v5002_v10 }
 0x1c2   : > { %1854 = vmatmul.bf16.gmra.mxu2 %v5003_v26  ;;  %v4634_v11 = vpack.c.bf16 %v2034_v22, %v2032_v38  ;;  %v1684_v26 = vadd.f32 %v4607_v0, %v4649_v63 }
 0x1c3   : > { %1903 = vmatmul.bf16.gmra.mxu3 %v4532_v34  ;;  %v3714_v34 = vld [vmem:[#allocation8 + $0x78] sm:$0xff] }
 0x1c4   : > { %2241 = vmatpush.bf16.msrb.mxu3 %v3714_v34  ;;  %v1689_v34 = vadd.f32 %v4625_v47, %v4649_v63 }
 0x1c5   : > { %v1659_v21 = vpop.f32.mrf.mxu2  ;;  %v1563_v51 = vpop.f32.mrf.mxu0 }
 0x1c6   : > { %v1660_v1 = vadd.f32 %v1659_v21, %v1611_v25  ;;  %v1564_v61 = vadd.f32 %v1563_v51, %v4561_v29  ;;  %v1612_v2 = vpop.f32.mrf.mxu1 }
 0x1c8   : > { %v1613_v37 = vadd.f32 %v1612_v2, %v1564_v61  ;;  %v2036_v32 = vmax.f32 %v1660_v1, 0.0  ;;  %2242 = vmatpush.bf16.msrb.mxu3 %v3713_v53  ;;  %v1698_v21 = vpop.f32.mrf.mxu3 }
 0x1cc   : > { %2243 = vmatpush.bf16.msrb.mxu3 %v3712_v43 }
 0x1cd   : > { %v1661_v48 = vpop.f32.mrf.mxu2  ;;  %v1566_v54 = vpop.f32.mrf.mxu0 }
 0x1ce   : > { %v1662_v5 = vadd.f32 %v1661_v48, %v1613_v37  ;;  %v1567_v33 = vadd.f32 %v1566_v54, %v4568_v4  ;;  %v1615_v55 = vpop.f32.mrf.mxu1  ;;  %v5009_v48 = vld [vmem:[#allocation22_spill] sm:$0xff]  ;;  %v1686_v54 = vadd.f32 %v4616_v6, %v4649_v63  ;;  %v5011_v6 = vld [vmem:[#allocation24_spill] sm:$0xff] }
 0x1d0   : > { %v2038_v35 = vmax.f32 %v1662_v5, 0.0  ;;  %v1616_v15 = vadd.f32 %v1615_v55, %v1567_v33  ;;  %1761 = vmatmul.bf16.gmra.mxu0 %v5004_v57  ;;  %v5010_v5 = vld [vmem:[#allocation23_spill] sm:$0xff]  ;;  %v1700_v33 = vpop.f32.mrf.mxu3 }
 0x1d1   : > { %1810 = vmatmul.bf16.gmra.mxu1 %v5005_v39 }
 0x1d2   : > { %1859 = vmatmul.bf16.gmra.mxu2 %v5006_v8  ;;  %v4644_v29 = vpack.c.bf16 %v2038_v35, %v2036_v32 }
 0x1d3   : > { %1908 = vmatmul.bf16.gmra.mxu3 %v4554_v16 }
 0x1d5   : > { %v1664_v30 = vpop.f32.mrf.mxu2  ;;  %v1568_v31 = vpop.f32.mrf.mxu0 }
 0x1d6   : > { %v1665_v4 = vadd.f32 %v1664_v30, %v1616_v15  ;;  %v1569_v44 = vadd.f32 %v1568_v31, %v4571_v14  ;;  %v1617_v46 = vpop.f32.mrf.mxu1 }
 0x1d8   : > { %v1618_v40 = vadd.f32 %v1617_v46, %v1569_v44  ;;  %v2040_v16 = vmax.f32 %v1665_v4, 0.0  ;;  %v1703_v31 = vpop.f32.mrf.mxu3  ;;  %v3711_v44 = vld [vmem:[#allocation8 + $0x60] sm:$0xff]  ;;  %v5012_v46 = vld [vmem:[#allocation25_spill] sm:$0xff] }
 0x1d9   : > { %2244 = vmatpush.bf16.msrb.mxu3 %v3711_v44  ;;  %v5017_v44 = vld [vmem:[#allocation30_spill] sm:$0xff] }
 0x1dd   : > { %v1666_v49 = vpop.f32.mrf.mxu2  ;;  %v1727_v60 = vpop.f32.mrf.mxu0 }
 0x1de   : > { %v1667_v59 = vadd.f32 %v1666_v49, %v1618_v40  ;;  %v1728_v18 = vadd.f32 %v1727_v60, %v1679_v58  ;;  %v1776_v20 = vpop.f32.mrf.mxu1  ;;  %v1691_v40 = vadd.f32 %v4628_v41, %v4649_v63  ;;  %v3710_v41 = vld [vmem:[#allocation8 + $0x58] sm:$0xff] }
 0x1df   : > { %2245 = vmatpush.bf16.msrb.mxu3 %v3710_v41 }
 0x1e0   : > { %v2042_v50 = vmax.f32 %v1667_v59, 0.0  ;;  %v1777_v13 = vadd.f32 %v1776_v20, %v1728_v18  ;;  %1922 = vmatmul.bf16.vlgmr.msrb.gmra.mxu0 %v5007_v45  ;;  %v1705_v20 = vpop.f32.mrf.mxu3 }
 0x1e1   : > { %1971 = vmatmul.bf16.vlgmr.msrb.gmra.mxu1 %v5008_v56 }
 0x1e2   : > { %2200 = vmatmul.bf16.vlgmr.msrb.gmra.mxu2 %v4580_v36  ;;  %v4657_v14 = vpack.c.bf16 %v2042_v50, %v2040_v16  ;;  %v1694_v16 = vadd.f32 %v4638_v3, %v4649_v63 }
 0x1e5   : > { %v1825_v19 = vpop.f32.mrf.mxu2  ;;  %v1729_v38 = vpop.f32.mrf.mxu0 }
 0x1e6   : > { %v4661_v52 = vadd.f32 %v1825_v19, %v1777_v13  ;;  %v1730_v22 = vadd.f32 %v1729_v38, %v1681_v27  ;;  %v1778_v25 = vpop.f32.mrf.mxu1  ;;  %v5013_v27 = vld [vmem:[#allocation26_spill] sm:$0xff]  ;;  %v5014_v19 = vld [vmem:[#allocation27_spill] sm:$0xff] }
 0x1e8   : > { %v1779_v10 = vadd.f32 %v1778_v25, %v1730_v22  ;;  %v1708_v38 = vpop.f32.mrf.mxu3  ;;  %v1696_v22 = vadd.f32 %v4646_v12, %v4649_v63  ;;  %v3709_v12 = vld [vmem:[#allocation8 + $0x50] sm:$0xff] }
 0x1e9   : > { %2246 = vmatpush.bf16.msrb.mxu3 %v3709_v12 }
 0x1ed   : > { %v1827_v1 = vpop.f32.mrf.mxu2  ;;  %v1732_v36 = vpop.f32.mrf.mxu0 }
 0x1ee   : > { %v4665_v51 = vadd.f32 %v1827_v1, %v1779_v10  ;;  %v1733_v61 = vadd.f32 %v1732_v36, %v1684_v26  ;;  %v1781_v2 = vpop.f32.mrf.mxu1 }
 0x1f0   : > { %v1782_v37 = vadd.f32 %v1781_v2, %v1733_v61  ;;  %1927 = vmatmul.bf16.gmra.mxu0 %v5009_v48  ;;  %v1699_v61 = vadd.f32 %v1698_v21, %v4649_v63 }
 0x1f1   : > { %1976 = vmatmul.bf16.gmra.mxu1 %v5010_v5 }
 0x1f2   : > { %2205 = vmatmul.bf16.gmra.mxu2 %v4590_v17 }
 0x1f5   : > { %v1830_v0 = vpop.f32.mrf.mxu2  ;;  %v1734_v32 = vpop.f32.mrf.mxu0 }
 0x1f6   : > { %v4672_v55 = vadd.f32 %v1830_v0, %v1782_v37  ;;  %v1735_v35 = vadd.f32 %v1734_v32, %v1686_v54  ;;  %v1783_v15 = vpop.f32.mrf.mxu1  ;;  %v1710_v37 = vpop.f32.mrf.mxu3  ;;  %v5015_v0 = vld [vmem:[#allocation28_spill] sm:$0xff]  ;;  %v5016_v32 = vld [vmem:[#allocation29_spill] sm:$0xff] }
 0x1f8   : > { %v1784_v57 = vadd.f32 %v1783_v15, %v1735_v35  ;;  %v1701_v35 = vadd.f32 %v1700_v33, %v4649_v63  ;;  %v1706_v33 = vadd.f32 %v1705_v20, %v4649_v63  ;;  %v1711_v20 = vadd.f32 %v1710_v37, %v4649_v63 }
 0x1fd   : > { %v1832_v39 = vpop.f32.mrf.mxu2  ;;  %v1737_v30 = vpop.f32.mrf.mxu0 }
 0x1fe   : > { %v4676_v8 = vadd.f32 %v1832_v39, %v1784_v57  ;;  %v1738_v17 = vadd.f32 %v1737_v30, %v1689_v34  ;;  %v1786_v4 = vpop.f32.mrf.mxu1  ;;  %v1713_v34 = vpop.f32.mrf.mxu3  ;;  %v1704_v30 = vadd.f32 %v1703_v31, %v4649_v63 }
 0x200   : > { %v1787_v42 = vadd.f32 %v1786_v4, %v1738_v17  ;;  %1932 = vmatmul.bf16.gmra.mxu0 %v5011_v6 }
 0x201   : > { %1981 = vmatmul.bf16.gmra.mxu1 %v5012_v46  ;;  %v3708_v46 = vld [vmem:[#allocation8 + $0x48] sm:$0xff] }
 0x202   : > { %2210 = vmatmul.bf16.gmra.mxu2 %v4600_v7  ;;  %2247 = vmatpush.bf16.msrb.mxu3 %v3708_v46 }
 0x205   : > { %v1835_v47 = vpop.f32.mrf.mxu2  ;;  %v1739_v49 = vpop.f32.mrf.mxu0 }
 0x206   : > { %v4683_v58 = vadd.f32 %v1835_v47, %v1787_v42  ;;  %v1740_v59 = vadd.f32 %v1739_v49, %v1691_v40  ;;  %v1788_v60 = vpop.f32.mrf.mxu1  ;;  %v5018_v40 = vld [vmem:[#allocation31_spill] sm:$0xff] }
 0x208   : > { %v1789_v18 = vadd.f32 %v1788_v60, %v1740_v59  ;;  %v1709_v60 = vadd.f32 %v1708_v38, %v4649_v63  ;;  %v1714_v38 = vadd.f32 %v1713_v34, %v4649_v63 }
 0x20d   : > { %v1837_v50 = vpop.f32.mrf.mxu2  ;;  %v1742_v45 = vpop.f32.mrf.mxu0 }
 0x20e   : > { %v4687_v13 = vadd.f32 %v1837_v50, %v1789_v18  ;;  %v1743_v7 = vadd.f32 %v1742_v45, %v1694_v16  ;;  %v1791_v53 = vpop.f32.mrf.mxu1 }
 0x210   : > { %v1792_v56 = vadd.f32 %v1791_v53, %v1743_v7  ;;  %1937 = vmatmul.bf16.gmra.mxu0 %v5013_v27 }
 0x211   : > { %1986 = vmatmul.bf16.gmra.mxu1 %v5014_v19 }
 0x212   : > { %2215 = vmatmul.bf16.gmra.mxu2 %v4612_v62 }
 0x215   : > { %v1840_v3 = vpop.f32.mrf.mxu2  ;;  %v1744_v10 = vpop.f32.mrf.mxu0 }
 0x216   : > { %v4694_v25 = vadd.f32 %v1840_v3, %v1792_v56  ;;  %v1745_v26 = vadd.f32 %v1744_v10, %v1696_v22  ;;  %v1793_v1 = vpop.f32.mrf.mxu1 }
 0x218   : > { %v1794_v36 = vadd.f32 %v1793_v1, %v1745_v26 }
 0x21d   : > { %v1842_v2 = vpop.f32.mrf.mxu2  ;;  %v1747_v43 = vpop.f32.mrf.mxu0 }
 0x21e   : > { %v4697_v48 = vadd.f32 %v1842_v2, %v1794_v36  ;;  %v1748_v62 = vadd.f32 %v1747_v43, %v1699_v61  ;;  %v1796_v5 = vpop.f32.mrf.mxu1 }
 0x220   : > { %v4699_v54 = vadd.f32 %v1796_v5, %v1748_v62  ;;  %1942 = vmatmul.bf16.gmra.mxu0 %v5015_v0 }
 0x221   : > { %1991 = vmatmul.bf16.gmra.mxu1 %v5016_v32 }
 0x222   : > { %2220 = vmatmul.bf16.gmra.mxu2 %v4622_v9  ;;  %v1715_v9 = vpop.f32.mrf.mxu3 }
 0x225   : > { %v1749_v21 = vpop.f32.mrf.mxu0 }
 0x226   : > { %v1750_v15 = vadd.f32 %v1749_v21, %v1701_v35  ;;  %v1798_v57 = vpop.f32.mrf.mxu1 }
 0x228   : > { %v4705_v39 = vadd.f32 %v1798_v57, %v1750_v15 }
 0x22a   : > { %v1874_v18 = vpop.f32.mrf.mxu3 }
 0x22b   : > { %v1875_v5 = vadd.f32 %v1874_v18, %v4661_v52 }
 0x22d   : > { %v1752_v17 = vpop.f32.mrf.mxu0 }
 0x22e   : > { %v1753_v4 = vadd.f32 %v1752_v17, %v1704_v30  ;;  %v1801_v42 = vpop.f32.mrf.mxu1 }
 0x230   : > { %v4708_v6 = vadd.f32 %v1801_v42, %v1753_v4  ;;  %1947 = vmatmul.bf16.gmra.mxu0 %v5017_v44 }
 0x231   : > { %1996 = vmatmul.bf16.gmra.mxu1 %v5018_v40 }
 0x232   : > { %2225 = vmatmul.bf16.gmra.mxu2 %v4634_v11  ;;  %v3707_v11 = vld [vmem:[#allocation8 + $0x40] sm:$0xff]  ;;  %v1876_v53 = vpop.f32.mrf.mxu3 }
 0x233   : > { %2248 = vmatpush.bf16.msrb.mxu3 %v3707_v11 }
 0x235   : > { %v1754_v47 = vpop.f32.mrf.mxu0 }
 0x236   : > { %v1755_v49 = vadd.f32 %v1754_v47, %v1706_v33  ;;  %v1803_v59 = vpop.f32.mrf.mxu1 }
 0x238   : > { %v4714_v31 = vadd.f32 %v1803_v59, %v1755_v49 }
 0x23d   : > { %v1757_v16 = vpop.f32.mrf.mxu0 }
 0x23e   : > { %v1758_v50 = vadd.f32 %v1757_v16, %v1709_v60  ;;  %v1806_v45 = vpop.f32.mrf.mxu1 }
 0x240   : > { %v4717_v7 = vadd.f32 %v1806_v45, %v1758_v50  ;;  %1952 = vmatmul.bf16.gmra.mxu0 %v4534_v23  ;;  %v1879_v23 = vpop.f32.mrf.mxu3  ;;  %v1845_v50 = vpop.f32.mrf.mxu2 }
 0x241   : > { %2001 = vmatmul.bf16.gmra.mxu1 %v4536_v24  ;;  %v5019_v24 = vld [vmem:[#allocation32_spill] sm:$0xff]  ;;  %v1880_v42 = vadd.f32 %v1879_v23, %v4672_v55 }
 0x242   : > { %2230 = vmatmul.bf16.gmra.mxu2 %v4644_v29  ;;  %v1716_v29 = vadd.f32 %v1715_v9, %v4649_v63 }
 0x245   : > { %v1759_v56 = vpop.f32.mrf.mxu0 }
 0x246   : > { %v1760_v27 = vadd.f32 %v1759_v56, %v1711_v20  ;;  %v1808_v41 = vpop.f32.mrf.mxu1 }
 0x248   : > { %v4723_v19 = vadd.f32 %v1808_v41, %v1760_v27  ;;  %v1881_v37 = vpop.f32.mrf.mxu3 }
 0x249   : > { %v1882_v52 = vadd.f32 %v1881_v37, %v4676_v8 }
 0x24d   : > { %v1762_v22 = vpop.f32.mrf.mxu0 }
 0x24e   : > { %v1763_v3 = vadd.f32 %v1762_v22, %v1714_v38  ;;  %v1811_v10 = vpop.f32.mrf.mxu1  ;;  %v1847_v38 = vpop.f32.mrf.mxu2 }
 0x250   : > { %v4726_v26 = vadd.f32 %v1811_v10, %v1763_v3  ;;  %1957 = vmatmul.bf16.gmra.mxu0 %v4556_v28  ;;  %v1884_v12 = vpop.f32.mrf.mxu3  ;;  %v1877_v28 = vadd.f32 %v1876_v53, %v4665_v51 }
 0x251   : > { %2006 = vmatmul.bf16.gmra.mxu1 %v5019_v24  ;;  %v1885_v45 = vadd.f32 %v1884_v12, %v4683_v58 }
 0x252   : > { %2235 = vmatmul.bf16.gmra.mxu2 %v4657_v14 }
 0x255   : > { %v1764_v1 = vpop.f32.mrf.mxu0 }
 0x256   : > { %v1765_v36 = vadd.f32 %v1764_v1, %v1716_v29  ;;  %v1813_v61 = vpop.f32.mrf.mxu1 }
 0x258   : > { %v4732_v2 = vadd.f32 %v1813_v61, %v1765_v36  ;;  %v1886_v30 = vpop.f32.mrf.mxu3  ;;  %v1850_v36 = vpop.f32.mrf.mxu2 }
 0x259   : > { %v1887_v20 = vadd.f32 %v1886_v30, %v4687_v13 }
 0x25d   : > { %v1923_v43 = vpop.f32.mrf.mxu0 }
 0x25e   : > { %v1972_v62 = vpop.f32.mrf.mxu1  ;;  %v1924_v0 = vadd.f32 %v1923_v43, %v1875_v5 }
 0x260   : > { %v1973_v35 = vadd.f32 %v1972_v62, %v1924_v0  ;;  %v1889_v33 = vpop.f32.mrf.mxu3 }
 0x261   : > { %v1890_v1 = vadd.f32 %v1889_v33, %v4694_v25 }
 0x262   : > { %v2013_v63 = vmax.f32 %v1973_v35, 0.0 }
 0x265   : > { %v1925_v32 = vpop.f32.mrf.mxu0 }
 0x266   : > { %v1926_v21 = vadd.f32 %v1925_v32, %v1877_v28  ;;  %v1974_v14 = vpop.f32.mrf.mxu1  ;;  %v1846_v32 = vadd.f32 %v1845_v50, %v4699_v54 }
 0x268   : > { %v1975_v15 = vadd.f32 %v1974_v14, %v1926_v21  ;;  %v1891_v11 = vpop.f32.mrf.mxu3  ;;  %v1852_v21 = vpop.f32.mrf.mxu2 }
 0x269   : > { %v1892_v61 = vadd.f32 %v1891_v11, %v4697_v48 }
 0x26a   : > { %v2015_v57 = vmax.f32 %v1975_v15, 0.0 }
 0x26c   : > { %v2045_v34 = vpack.c.bf16 %v2015_v57, %v2013_v63  ;;  %v1848_v57 = vadd.f32 %v1847_v38, %v4705_v39  ;;  %v1853_v39 = vadd.f32 %v1852_v21, %v4714_v31 }
 0x26d   : > { %v1928_v17 = vpop.f32.mrf.mxu0 }
 0x26e   : > { %v1977_v4 = vpop.f32.mrf.mxu1  ;;  %2249 = vmatmul.bf16.vlgmr.msrb.gmra.mxu3 %v2045_v34  ;;  %v1929_v44 = vadd.f32 %v1928_v17, %v1880_v42 }
 0x270   : > { %v1978_v9 = vadd.f32 %v1977_v4, %v1929_v44  ;;  %v1894_v10 = vpop.f32.mrf.mxu3  ;;  %v1855_v44 = vpop.f32.mrf.mxu2 }
 0x271   : > { %v1895_v63 = vadd.f32 %v1894_v10, %v1846_v32 }
 0x272   : > { %v2017_v49 = vmax.f32 %v1978_v9, 0.0 }
 0x275   : > { %v1930_v46 = vpop.f32.mrf.mxu0 }
 0x276   : > { %v1931_v51 = vadd.f32 %v1930_v46, %v1882_v52  ;;  %v1979_v40 = vpop.f32.mrf.mxu1 }
 0x278   : > { %v1980_v47 = vadd.f32 %v1979_v40, %v1931_v51  ;;  %v1896_v13 = vpop.f32.mrf.mxu3  ;;  %v1851_v51 = vadd.f32 %v1850_v36, %v4708_v6  ;;  %v1856_v6 = vadd.f32 %v1855_v44, %v4717_v7 }
 0x279   : > { %v1897_v34 = vadd.f32 %v1896_v13, %v1848_v57 }
 0x27a   : > { %v2019_v59 = vmax.f32 %v1980_v47, 0.0 }
 0x27c   : > { %v2047_v60 = vpack.c.bf16 %v2019_v59, %v2017_v49  ;;  %v1857_v59 = vpop.f32.mrf.mxu2 }
 0x27d   : > { %v1933_v18 = vpop.f32.mrf.mxu0 }
 0x27e   : > { %v1982_v16 = vpop.f32.mrf.mxu1  ;;  %2254 = vmatmul.bf16.gmra.mxu3 %v2047_v60  ;;  %v1934_v55 = vadd.f32 %v1933_v18, %v1885_v45 }
 0x280   : > { %v1983_v53 = vadd.f32 %v1982_v16, %v1934_v55  ;;  %v1899_v25 = vpop.f32.mrf.mxu3 }
 0x281   : > { %v1900_v49 = vadd.f32 %v1899_v25, %v1851_v51 }
 0x282   : > { %v2021_v22 = vmax.f32 %v1983_v53, 0.0 }
 0x285   : > { %v1935_v8 = vpop.f32.mrf.mxu0 }
 0x286   : > { %v1936_v56 = vadd.f32 %v1935_v8, %v1887_v20  ;;  %v1984_v27 = vpop.f32.mrf.mxu1 }
 0x288   : > { %v1985_v41 = vadd.f32 %v1984_v27, %v1936_v56  ;;  %v1901_v46 = vpop.f32.mrf.mxu3  ;;  %v1860_v56 = vpop.f32.mrf.mxu2 }
 0x289   : > { %v1902_v16 = vadd.f32 %v1901_v46, %v1853_v39  ;;  %v1861_v7 = vadd.f32 %v1860_v56, %v4726_v26 }
 0x28a   : > { %v2023_v3 = vmax.f32 %v1985_v41, 0.0 }
 0x28c   : > { %v2049_v23 = vpack.c.bf16 %v2023_v3, %v2021_v22  ;;  %v1858_v3 = vadd.f32 %v1857_v59, %v4723_v19 }
 0x28d   : > { %v1938_v24 = vpop.f32.mrf.mxu0 }
 0x28e   : > { %v1987_v29 = vpop.f32.mrf.mxu1  ;;  %2259 = vmatmul.bf16.gmra.mxu3 %v2049_v23  ;;  %v1939_v58 = vadd.f32 %v1938_v24, %v1890_v1 }
 0x290   : > { %v1988_v43 = vadd.f32 %v1987_v29, %v1939_v58  ;;  %v1904_v18 = vpop.f32.mrf.mxu3  ;;  %v1862_v24 = vpop.f32.mrf.mxu2 }
 0x291   : > { %v1905_v31 = vadd.f32 %v1904_v18, %v1856_v6  ;;  %v1863_v19 = vadd.f32 %v1862_v24, %v4732_v2 }
 0x292   : > { %v2025_v12 = vmax.f32 %v1988_v43, 0.0 }
 0x295   : > { %v1940_v37 = vpop.f32.mrf.mxu0 }
 0x296   : > { %v1941_v62 = vadd.f32 %v1940_v37, %v1892_v61  ;;  %v1989_v5 = vpop.f32.mrf.mxu1 }
 0x298   : > { %v1990_v0 = vadd.f32 %v1989_v5, %v1941_v62  ;;  %v1906_v41 = vpop.f32.mrf.mxu3 }
 0x299   : > { %v1907_v23 = vadd.f32 %v1906_v41, %v1858_v3 }
 0x29a   : > { %v2027_v28 = vmax.f32 %v1990_v0, 0.0 }
 0x29c   : > { %v2051_v35 = vpack.c.bf16 %v2027_v28, %v2025_v12  ;;  %v2201_v12 = vpop.f32.mrf.mxu2 }
 0x29d   : > { %v1943_v14 = vpop.f32.mrf.mxu0 }
 0x29e   : > { %v1992_v15 = vpop.f32.mrf.mxu1  ;;  %2264 = vmatmul.bf16.gmra.mxu3 %v2051_v35  ;;  %v1944_v48 = vadd.f32 %v1943_v14, %v1895_v63 }
 0x2a0   : > { %v1993_v17 = vadd.f32 %v1992_v15, %v1944_v48  ;;  %v1909_v61 = vpop.f32.mrf.mxu3 }
 0x2a1   : > { %v1910_v28 = vadd.f32 %v1909_v61, %v1861_v7 }
 0x2a2   : > { %v2029_v9 = vmax.f32 %v1993_v17, 0.0 }
 0x2a4   : > { %v2203_v48 = vpop.f32.mrf.mxu2 }
 0x2a5   : > { %v1945_v30 = vpop.f32.mrf.mxu0 }
 0x2a6   : > { %v1946_v4 = vadd.f32 %v1945_v30, %v1897_v34  ;;  %v1994_v42 = vpop.f32.mrf.mxu1 }
 0x2a8   : > { %v1995_v52 = vadd.f32 %v1994_v42, %v1946_v4  ;;  %v1911_v32 = vpop.f32.mrf.mxu3  ;;  %v4753_v4 = vld [vmem:[%s4956_s4] ss:$0 sm:$0xff] }
 0x2a9   : > { %v1912_v21 = vadd.f32 %v1911_v32, %v1863_v19  ;;  %v2202_v42 = vadd.f32 %v4753_v4, %v2201_v12 }
 0x2aa   : > { %v2031_v54 = vmax.f32 %v1995_v52, 0.0 }
 0x2ac   : > { %v2053_v40 = vpack.c.bf16 %v2031_v54, %v2029_v9  ;;  %v2206_v17 = vpop.f32.mrf.mxu2  ;;  %v2204_v9 = vadd.f32 %v4753_v4, %v2203_v48 }
 0x2ad   : > { %v1948_v33 = vpop.f32.mrf.mxu0 }
 0x2ae   : > { %v1997_v47 = vpop.f32.mrf.mxu1  ;;  %2269 = vmatmul.bf16.gmra.mxu3 %v2053_v40  ;;  %v1949_v60 = vadd.f32 %v1948_v33, %v1900_v49  ;;  %v2207_v40 = vadd.f32 %v4753_v4, %v2206_v17 }
 0x2b0   : > { %v1998_v45 = vadd.f32 %v1997_v47, %v1949_v60 }
 0x2b2   : > { %v2033_v8 = vmax.f32 %v1998_v45, 0.0 }
 0x2b4   : > { %v2208_v2 = vpop.f32.mrf.mxu2 }
 0x2b5   : > { %v1950_v50 = vpop.f32.mrf.mxu0  ;;  %v2209_v39 = vadd.f32 %v4753_v4, %v2208_v2 }
 0x2b6   : > { %v1951_v11 = vadd.f32 %v1950_v50, %v1902_v16  ;;  %v1999_v55 = vpop.f32.mrf.mxu1 }
 0x2b8   : > { %v2000_v20 = vadd.f32 %v1999_v55, %v1951_v11 }
 0x2ba   : > { %v2035_v53 = vmax.f32 %v2000_v20, 0.0 }
 0x2bc   : > { %v2055_v27 = vpack.c.bf16 %v2035_v53, %v2033_v8  ;;  %v2211_v46 = vpop.f32.mrf.mxu2 }
 0x2bd   : > { %v1953_v38 = vpop.f32.mrf.mxu0  ;;  %v2212_v16 = vadd.f32 %v4753_v4, %v2211_v46 }
 0x2be   : > { %v2002_v22 = vpop.f32.mrf.mxu1  ;;  %2274 = vmatmul.bf16.gmra.mxu3 %v2055_v27  ;;  %v1954_v10 = vadd.f32 %v1953_v38, %v1905_v31 }
 0x2c0   : > { %v2003_v1 = vadd.f32 %v2002_v22, %v1954_v10 }
 0x2c2   : > { %v2037_v37 = vmax.f32 %v2003_v1, 0.0 }
 0x2c4   : > { %v2213_v33 = vpop.f32.mrf.mxu2 }
 0x2c5   : > { %v1955_v29 = vpop.f32.mrf.mxu0  ;;  %v2214_v55 = vadd.f32 %v4753_v4, %v2213_v33 }
 0x2c6   : > { %v1956_v58 = vadd.f32 %v1955_v29, %v1907_v23  ;;  %v2004_v36 = vpop.f32.mrf.mxu1 }
 0x2c8   : > { %v2005_v13 = vadd.f32 %v2004_v36, %v1956_v58 }
 0x2ca   : > { %v2039_v43 = vmax.f32 %v2005_v13, 0.0 }
 0x2cc   : > { %v2057_v62 = vpack.c.bf16 %v2039_v43, %v2037_v37  ;;  %v2216_v18 = vpop.f32.mrf.mxu2 }
 0x2cd   : > { %v1958_v5 = vpop.f32.mrf.mxu0  ;;  %v2217_v56 = vadd.f32 %v4753_v4, %v2216_v18 }
 0x2ce   : > { %v2007_v0 = vpop.f32.mrf.mxu1  ;;  %2279 = vmatmul.bf16.gmra.mxu3 %v2057_v62  ;;  %v1959_v35 = vadd.f32 %v1958_v5, %v1910_v28 }
 0x2d0   : > { %v2008_v15 = vadd.f32 %v2007_v0, %v1959_v35 }
 0x2d2   : > { %v2041_v34 = vmax.f32 %v2008_v15, 0.0 }
 0x2d4   : > { %v2218_v11 = vpop.f32.mrf.mxu2 }
 0x2d5   : > { %v1960_v14 = vpop.f32.mrf.mxu0  ;;  %v2219_v41 = vadd.f32 %v4753_v4, %v2218_v11 }
 0x2d6   : > { %v1961_v25 = vadd.f32 %v1960_v14, %v1912_v21  ;;  %v2009_v63 = vpop.f32.mrf.mxu1 }
 0x2d8   : > { %v2010_v57 = vadd.f32 %v2009_v63, %v1961_v25 }
 0x2da   : > { %v2043_v30 = vmax.f32 %v2010_v57, 0.0 }
 0x2dc   : > { %v2059_v26 = vpack.c.bf16 %v2043_v30, %v2041_v34  ;;  %v2221_v53 = vpop.f32.mrf.mxu2 }
 0x2dd   : > { %v2222_v3 = vadd.f32 %v4753_v4, %v2221_v53 }
 0x2de   : > { %2284 = vmatmul.bf16.gmra.mxu3 %v2059_v26 }
 0x2e4   : > { %v2223_v38 = vpop.f32.mrf.mxu2 }
 0x2e5   : > { %v2224_v29 = vadd.f32 %v4753_v4, %v2223_v38 }
 0x2ec   : > { %v2226_v24 = vpop.f32.mrf.mxu2 }
 0x2ed   : > { %v2227_v61 = vadd.f32 %v4753_v4, %v2226_v24 }
 0x2f1   : > { %v2250_v44 = vpop.f32.mrf.mxu3 }
 0x2f2   : > { %v4756_v52 = vadd.f32 %v2250_v44, %v2202_v42 }
 0x2f4   : > { %2290 = vmax.xlane.f32.xlu0 %v4756_v52  ;;  %v2228_v36 = vpop.f32.mrf.mxu2 }
 0x2f5   : > { %v2229_v7 = vadd.f32 %v4753_v4, %v2228_v36 }
 0x2f9   : > { %v2252_v54 = vpop.f32.mrf.mxu3 }
 0x2fa   : > { %v4760_v51 = vadd.f32 %v2252_v54, %v2204_v9 }
 0x2fc   : > { %2292 = vmax.xlane.f32.xlu0 %v4760_v51  ;;  %v2231_v43 = vpop.f32.mrf.mxu2 }
 0x2fd   : > { %v2232_v0 = vadd.f32 %v4753_v4, %v2231_v43 }
 0x301   : > { %v2255_v47 = vpop.f32.mrf.mxu3 }
 0x302   : > { %v4764_v49 = vadd.f32 %v2255_v47, %v2207_v40 }
 0x304   : > { %2294 = vmax.xlane.f32.xlu1 %v4764_v49  ;;  %v2233_v12 = vpop.f32.mrf.mxu2 }
 0x305   : > { %v2234_v32 = vadd.f32 %v4753_v4, %v2233_v12 }
 0x309   : > { %v2257_v59 = vpop.f32.mrf.mxu3 }
 0x30a   : > { %v4768_v60 = vadd.f32 %v2257_v59, %v2209_v39 }
 0x30c   : > { %2296 = vmax.xlane.f32.xlu1 %v4768_v60  ;;  %v2236_v14 = vpop.f32.mrf.mxu2 }
 0x30d   : > { %v2237_v15 = vadd.f32 %v4753_v4, %v2236_v14 }
 0x311   : > { %v2260_v50 = vpop.f32.mrf.mxu3 }
 0x312   : > { %v4772_v45 = vadd.f32 %v2260_v50, %v2212_v16 }
 0x314   : > { %2298 = vmax.xlane.f32.xlu2 %v4772_v45  ;;  %v2238_v57 = vpop.f32.mrf.mxu2 }
 0x315   : > { %v2239_v34 = vadd.f32 %v4753_v4, %v2238_v57 }
 0x319   : > { %v2262_v20 = vpop.f32.mrf.mxu3 }
 0x31a   : > { %v4776_v8 = vadd.f32 %v2262_v20, %v2214_v55 }
 0x31c   : > { %2300 = vmax.xlane.f32.xlu2 %v4776_v8 }
 0x321   : > { %v2265_v6 = vpop.f32.mrf.mxu3 }
 0x322   : > { %v4780_v27 = vadd.f32 %v2265_v6, %v2217_v56 }
 0x324   : > { %2302 = vmax.xlane.f32.xlu0 %v4780_v27 }
 0x329   : > { %v2267_v22 = vpop.f32.mrf.mxu3 }
 0x32a   : > { %v4784_v31 = vadd.f32 %v2267_v22, %v2219_v41 }
 0x32c   : > { %2304 = vmax.xlane.f32.xlu1 %v4784_v31 }
 0x331   : > { %v2270_v10 = vpop.f32.mrf.mxu3 }
 0x332   : > { %v4788_v23 = vadd.f32 %v2270_v10, %v2222_v3 }
 0x334   : > { %2306 = vmax.xlane.f32.xlu2 %v4788_v23 }
 0x339   : > { %v2272_v1 = vpop.f32.mrf.mxu3 }
 0x33a   : > { %v4792_v58 = vadd.f32 %v2272_v1, %v2224_v29 }
 0x33c   : > { %2308 = vmax.xlane.f32.xlu0 %v4792_v58 }
 0x341   : > { %v2275_v13 = vpop.f32.mrf.mxu3 }
 0x342   : > { %v4796_v37 = vadd.f32 %v2275_v13, %v2227_v61 }
 0x344   : > { %2310 = vmax.xlane.f32.xlu1 %v4796_v37 }
 0x349   : > { %v2277_v62 = vpop.f32.mrf.mxu3 }
 0x34a   : > { %v4800_v5 = vadd.f32 %v2277_v62, %v2229_v7 }
 0x34c   : > { %2312 = vmax.xlane.f32.xlu2 %v4800_v5 }
 0x351   : > { %v2280_v28 = vpop.f32.mrf.mxu3 }
 0x352   : > { %v4804_v19 = vadd.f32 %v2280_v28, %v2232_v0 }
 0x354   : > { %2314 = vmax.xlane.f32.xlu0 %v4804_v19 }
 0x359   : > { %v2282_v35 = vpop.f32.mrf.mxu3 }
 0x35a   : > { %v4808_v21 = vadd.f32 %v2282_v35, %v2234_v32 }
 0x35c   : > { %2316 = vmax.xlane.f32.xlu1 %v4808_v21 }
 0x361   : > { %v2285_v25 = vpop.f32.mrf.mxu3 }
 0x362   : > { %v4812_v63 = vadd.f32 %v2285_v25, %v2237_v15 }
 0x364   : > { %2318 = vmax.xlane.f32.xlu2 %v4812_v63 }
 0x367   : > { %v2291_v48 = vpop.xlane.xlu0 %2290 }
 0x368   : > { %v2322_v30 = vsub.f32 %v4756_v52, %v2291_v48 }
 0x369   : > { %v2287_v26 = vpop.f32.mrf.mxu3 }
 0x36a   : > { %v2338_v17 = vmul.f32 1.442695, %v2322_v30  ;;  %v4817_v2 = vadd.f32 %v2287_v26, %v2239_v34 }
 0x36c   : > { %3805 = vpow2.f32 %v2338_v17  ;;  %2320 = vmax.xlane.f32.xlu0 %v4817_v2 }
 0x36f   : > { %v2293_v42 = vpop.xlane.xlu0 %2292 }
 0x370   : > { %v2323_v44 = vsub.f32 %v4760_v51, %v2293_v42 }
 0x372   : > { %v4821_v46 = vpop.eup %3805  ;;  %v2340_v9 = vmul.f32 1.442695, %v2323_v44 }
 0x373   : > { %2370 = vadd.xlane.f32.xlu1 %v4821_v46 }
 0x374   : > { %3807 = vpow2.f32 %v2340_v9 }
 0x377   : > { %v2295_v54 = vpop.xlane.xlu1 %2294 }
 0x378   : > { %v2324_v4 = vsub.f32 %v4764_v49, %v2295_v54 }
 0x37a   : > { %v4825_v52 = vpop.eup %3807  ;;  %v2342_v40 = vmul.f32 1.442695, %v2324_v4 }
 0x37b   : > { %2372 = vadd.xlane.f32.xlu2 %v4825_v52 }
 0x37c   : > { %3809 = vpow2.f32 %v2342_v40 }
 0x37f   : > { %v2297_v33 = vpop.xlane.xlu1 %2296 }
 0x380   : > { %v2325_v47 = vsub.f32 %v4768_v60, %v2297_v33 }
 0x382   : > { %v4829_v39 = vpop.eup %3809  ;;  %v2344_v51 = vmul.f32 1.442695, %v2325_v47 }
 0x383   : > { %2374 = vadd.xlane.f32.xlu0 %v4829_v39 }
 0x384   : > { %3811 = vpow2.f32 %v2344_v51 }
 0x387   : > { %v2299_v59 = vpop.xlane.xlu2 %2298 }
 0x388   : > { %v2326_v18 = vsub.f32 %v4772_v45, %v2299_v59 }
 0x38a   : > { %v4833_v16 = vpop.eup %3811  ;;  %v2346_v49 = vmul.f32 1.442695, %v2326_v18 }
 0x38b   : > { %2376 = vadd.xlane.f32.xlu1 %v4833_v16 }
 0x38c   : > { %3813 = vpow2.f32 %v2346_v49 }
 0x38f   : > { %v2301_v50 = vpop.xlane.xlu2 %2300 }
 0x390   : > { %v2327_v11 = vsub.f32 %v4776_v8, %v2301_v50 }
 0x392   : > { %v4837_v55 = vpop.eup %3813  ;;  %v2348_v60 = vmul.f32 1.442695, %v2327_v11 }
 0x393   : > { %2378 = vadd.xlane.f32.xlu2 %v4837_v55 }
 0x394   : > { %3815 = vpow2.f32 %v2348_v60 }
 0x397   : > { %v2303_v20 = vpop.xlane.xlu0 %2302 }
 0x398   : > { %v2328_v53 = vsub.f32 %v4780_v27, %v2303_v20 }
 0x39a   : > { %v4841_v56 = vpop.eup %3815  ;;  %v2350_v45 = vmul.f32 1.442695, %v2328_v53 }
 0x39b   : > { %2380 = vadd.xlane.f32.xlu0 %v4841_v56 }
 0x39c   : > { %3817 = vpow2.f32 %v2350_v45 }
 0x39f   : > { %v2305_v6 = vpop.xlane.xlu1 %2304 }
 0x3a0   : > { %v2329_v41 = vsub.f32 %v4784_v31, %v2305_v6 }
 0x3a2   : > { %v4845_v38 = vpop.eup %3817  ;;  %v2352_v8 = vmul.f32 1.442695, %v2329_v41 }
 0x3a3   : > { %2382 = vadd.xlane.f32.xlu1 %v4845_v38 }
 0x3a4   : > { %3819 = vpow2.f32 %v2352_v8 }
 0x3a7   : > { %v2307_v22 = vpop.xlane.xlu2 %2306 }
 0x3a8   : > { %v2330_v3 = vsub.f32 %v4788_v23, %v2307_v22 }
 0x3aa   : > { %v4849_v10 = vpop.eup %3819  ;;  %v2354_v27 = vmul.f32 1.442695, %v2330_v3 }
 0x3ab   : > { %2384 = vadd.xlane.f32.xlu2 %v4849_v10 }
 0x3ac   : > { %3821 = vpow2.f32 %v2354_v27 }
 0x3af   : > { %v2309_v24 = vpop.xlane.xlu0 %2308 }
 0x3b0   : > { %v2331_v29 = vsub.f32 %v4792_v58, %v2309_v24 }
 0x3b2   : > { %v4853_v1 = vpop.eup %3821  ;;  %v2356_v31 = vmul.f32 1.442695, %v2331_v29 }
 0x3b3   : > { %2386 = vadd.xlane.f32.xlu0 %v4853_v1 }
 0x3b4   : > { %3823 = vpow2.f32 %v2356_v31 }
 0x3b7   : > { %v2311_v36 = vpop.xlane.xlu1 %2310 }
 0x3b8   : > { %v2332_v61 = vsub.f32 %v4796_v37, %v2311_v36 }
 0x3ba   : > { %v4857_v13 = vpop.eup %3823  ;;  %v2358_v23 = vmul.f32 1.442695, %v2332_v61 }
 0x3bb   : > { %2388 = vadd.xlane.f32.xlu1 %v4857_v13 }
 0x3bc   : > { %3825 = vpow2.f32 %v2358_v23 }
 0x3bf   : > { %v2313_v43 = vpop.xlane.xlu2 %2312 }
 0x3c0   : > { %v2333_v7 = vsub.f32 %v4800_v5, %v2313_v43 }
 0x3c2   : > { %v4861_v62 = vpop.eup %3825  ;;  %v2360_v58 = vmul.f32 1.442695, %v2333_v7 }
 0x3c3   : > { %2390 = vadd.xlane.f32.xlu2 %v4861_v62 }
 0x3c4   : > { %3827 = vpow2.f32 %v2360_v58 }
 0x3c7   : > { %v2315_v0 = vpop.xlane.xlu0 %2314 }
 0x3c8   : > { %v2334_v12 = vsub.f32 %v4804_v19, %v2315_v0 }
 0x3ca   : > { %v4865_v28 = vpop.eup %3827  ;;  %v2362_v37 = vmul.f32 1.442695, %v2334_v12 }
 0x3cb   : > { %2392 = vadd.xlane.f32.xlu0 %v4865_v28 }
 0x3cc   : > { %3829 = vpow2.f32 %v2362_v37 }
 0x3cf   : > { %v2317_v32 = vpop.xlane.xlu1 %2316 }
 0x3d0   : > { %v2335_v35 = vsub.f32 %v4808_v21, %v2317_v32 }
 0x3d2   : > { %v4869_v14 = vpop.eup %3829  ;;  %v2364_v5 = vmul.f32 1.442695, %v2335_v35 }
 0x3d3   : > { %2394 = vadd.xlane.f32.xlu1 %v4869_v14 }
 0x3d4   : > { %3831 = vpow2.f32 %v2364_v5 }
 0x3d7   : > { %v2319_v15 = vpop.xlane.xlu2 %2318 }
 0x3d8   : > { %v2336_v25 = vsub.f32 %v4812_v63, %v2319_v15 }
 0x3da   : > { %v4873_v57 = vpop.eup %3831  ;;  %v2366_v19 = vmul.f32 1.442695, %v2336_v25 }
 0x3db   : > { %2396 = vadd.xlane.f32.xlu2 %v4873_v57 }
 0x3dc   : > { %3833 = vpow2.f32 %v2366_v19 }
 0x3df   : > { %v2321_v48 = vpop.xlane.xlu0 %2320 }
 0x3e0   : > { %v2337_v34 = vsub.f32 %v4817_v2, %v2321_v48 }
 0x3e2   : > { %v4877_v30 = vpop.eup %3833  ;;  %v2368_v21 = vmul.f32 1.442695, %v2337_v34 }
 0x3e3   : > { %2398 = vadd.xlane.f32.xlu0 %v4877_v30 }
 0x3e4   : > { %3835 = vpow2.f32 %v2368_v21 }
 0x3e6   : > { %v2371_v26 = vpop.xlane.xlu1 %2370 }
 0x3e7   : > { %3837 = vrcp.f32 %v2371_v26  ;;  %v2413_v54 = vand.u32 2147483648, %v2371_v26  ;;  %v2411_v4 = vand.u32 2147483647, %v2371_v26  ;;  %vm2407_vm1 = vweird.f32 %v2371_v26 }
 0x3e9   : > { %v2414_v47 = vor.u32 1.1754944e-38, %v2413_v54  ;;  %vm2412_vm3 = vcmp.eq.f32.partialorder %v2411_v4, 8.507059e+37 }
 0x3ea   : > { %v4880_v17 = vpop.eup %3835 }
 0x3eb   : > { %2400 = vadd.xlane.f32.xlu1 %v4880_v17 }
 0x3ed   : > { %v3838_v63 = vpop.eup %3837 }
 0x3ee   : > { %v2403_v42 = vmul.f32 %v3838_v63, %v2371_v26  ;;  %v2373_v44 = vpop.xlane.xlu2 %2372  ;;  %vm2408_vm0 = vweird.f32 %v3838_v63 }
 0x3ef   : > { %3839 = vrcp.f32 %v2373_v44  ;;  %vm2409_vm2 = vmor %vm2407_vm1, %vm2408_vm0  ;;  %v2427_v60 = vand.u32 2147483648, %v2373_v44  ;;  %v2425_v53 = vand.u32 2147483647, %v2373_v44  ;;  %vm2421_vm5 = vweird.f32 %v2373_v44 }
 0x3f0   : > { %v2404_v9 = vsub.f32 1.0, %v2403_v42 }
 0x3f1   : > { %v2428_v41 = vor.u32 1.1754944e-38, %v2427_v60  ;;  %vm2426_vm7 = vcmp.eq.f32.partialorder %v2425_v53, 8.507059e+37 }
 0x3f2   : > { %v2405_v2 = vmul.f32 %v3838_v63, %v2404_v9 }
 0x3f4   : > { %v2406_v40 = vadd.f32 %v3838_v63, %v2405_v2 }
 0x3f5   : > { %v3840_v33 = vpop.eup %3839 }
 0x3f6   : > { %v2410_v51 = vsel %vm2409_vm2, %v3838_v63, %v2406_v40  ;;  %v2417_v59 = vmul.f32 %v3840_v33, %v2373_v44  ;;  %v2375_v18 = vpop.xlane.xlu0 %2374  ;;  %vm2422_vm4 = vweird.f32 %v3840_v33 }
 0x3f7   : > { %v2415_v49 = vsel %vm2412_vm3, %v2414_v47, %v2410_v51  ;;  %3841 = vrcp.f32 %v2375_v18  ;;  %vm2423_vm6 = vmor %vm2421_vm5, %vm2422_vm4  ;;  %v2441_v29 = vand.u32 2147483648, %v2375_v18  ;;  %v2439_v36 = vand.u32 2147483647, %v2375_v18 }
 0x3f8   : > { %v2626_v50 = vmul.f32 %v4821_v46, %v2415_v49  ;;  %v2418_v11 = vsub.f32 1.0, %v2417_v59  ;;  %vm2435_vm9 = vweird.f32 %v2375_v18 }
 0x3f9   : > { %v2442_v43 = vor.u32 1.1754944e-38, %v2441_v29  ;;  %vm2440_vm11 = vcmp.eq.f32.partialorder %v2439_v36, 8.507059e+37 }
 0x3fa   : > { %2642 = vst [vmem:[%s4885_s17] sm:$0xff] %v2626_v50  ;;  %v2419_v20 = vmul.f32 %v3840_v33, %v2418_v11 }
 0x3fc   : > { %v2420_v45 = vadd.f32 %v3840_v33, %v2419_v20 }
 0x3fd   : > { %v3842_v6 = vpop.eup %3841 }
 0x3fe   : > { %v2424_v8 = vsel %vm2423_vm6, %v3840_v33, %v2420_v45  ;;  %v2431_v22 = vmul.f32 %v3842_v6, %v2375_v18  ;;  %v2377_v3 = vpop.xlane.xlu1 %2376  ;;  %vm2436_vm8 = vweird.f32 %v3842_v6 }
 0x3ff   : > { %v2429_v46 = vsel %vm2426_vm7, %v2428_v41, %v2424_v8  ;;  %3843 = vrcp.f32 %v2377_v3  ;;  %vm2437_vm10 = vmor %vm2435_vm9, %vm2436_vm8  ;;  %v2455_v32 = vand.u32 2147483648, %v2377_v3  ;;  %v2453_v5 = vand.u32 2147483647, %v2377_v3 }
 0x400   : > { %v2627_v27 = vmul.f32 %v4825_v52, %v2429_v46  ;;  %v2432_v24 = vsub.f32 1.0, %v2431_v22  ;;  %vm2449_vm13 = vweird.f32 %v2377_v3 }
 0x401   : > { %v2456_v19 = vor.u32 1.1754944e-38, %v2455_v32  ;;  %vm2454_vm15 = vcmp.eq.f32.partialorder %v2453_v5, 8.507059e+37 }
 0x402   : > { %2643 = vst [vmem:[%s4885_s17 + $0x8] sm:$0xff] %v2627_v27  ;;  %v2433_v31 = vmul.f32 %v3842_v6, %v2432_v24 }
 0x404   : > { %v2434_v61 = vadd.f32 %v3842_v6, %v2433_v31 }
 0x405   : > { %v3844_v23 = vpop.eup %3843 }
 0x406   : > { %v2438_v7 = vsel %vm2437_vm10, %v3842_v6, %v2434_v61  ;;  %v2445_v58 = vmul.f32 %v3844_v23, %v2377_v3  ;;  %v2379_v0 = vpop.xlane.xlu2 %2378  ;;  %vm2450_vm12 = vweird.f32 %v3844_v23 }
 0x407   : > { %v2443_v12 = vsel %vm2440_vm11, %v2442_v43, %v2438_v7  ;;  %3845 = vrcp.f32 %v2379_v0  ;;  %vm2451_vm14 = vmor %vm2449_vm13, %vm2450_vm12  ;;  %v2469_v42 = vand.u32 2147483648, %v2379_v0  ;;  %v2467_v9 = vand.u32 2147483647, %v2379_v0 }
 0x408   : > { %v2628_v52 = vmul.f32 %v4829_v39, %v2443_v12  ;;  %v2446_v37 = vsub.f32 1.0, %v2445_v58  ;;  %vm2463_vm1 = vweird.f32 %v2379_v0 }
 0x409   : > { %v2470_v4 = vor.u32 1.1754944e-38, %v2469_v42  ;;  %vm2468_vm3 = vcmp.eq.f32.partialorder %v2467_v9, 8.507059e+37 }
 0x40a   : > { %2644 = vst [vmem:[%s4885_s17 + $0x10] sm:$0xff] %v2628_v52  ;;  %v2447_v35 = vmul.f32 %v3844_v23, %v2446_v37 }
 0x40c   : > { %v2448_v15 = vadd.f32 %v3844_v23, %v2447_v35 }
 0x40d   : > { %v3846_v25 = vpop.eup %3845 }
 0x40e   : > { %v2452_v48 = vsel %vm2451_vm14, %v3844_v23, %v2448_v15  ;;  %v2459_v34 = vmul.f32 %v3846_v25, %v2379_v0  ;;  %v2381_v21 = vpop.xlane.xlu0 %2380  ;;  %vm2464_vm0 = vweird.f32 %v3846_v25 }
 0x40f   : > { %v2457_v26 = vsel %vm2454_vm15, %v2456_v19, %v2452_v48  ;;  %3847 = vrcp.f32 %v2381_v21  ;;  %vm2465_vm2 = vmor %vm2463_vm1, %vm2464_vm0  ;;  %v2483_v18 = vand.u32 2147483648, %v2381_v21  ;;  %v2481_v50 = vand.u32 2147483647, %v2381_v21 }
 0x410   : > { %v2629_v39 = vmul.f32 %v4833_v16, %v2457_v26  ;;  %v2460_v63 = vsub.f32 1.0, %v2459_v34  ;;  %vm2477_vm5 = vweird.f32 %v2381_v21 }
 0x411   : > { %v2484_v20 = vor.u32 1.1754944e-38, %v2483_v18  ;;  %vm2482_vm7 = vcmp.eq.f32.partialorder %v2481_v50, 8.507059e+37 }
 0x412   : > { %2645 = vst [vmem:[%s4885_s17 + $0x18] sm:$0xff] %v2629_v39  ;;  %v2461_v44 = vmul.f32 %v3846_v25, %v2460_v63 }
 0x414   : > { %v2462_v54 = vadd.f32 %v3846_v25, %v2461_v44 }
 0x415   : > { %v3848_v2 = vpop.eup %3847 }
 0x416   : > { %v2466_v40 = vsel %vm2465_vm2, %v3846_v25, %v2462_v54  ;;  %v2473_v33 = vmul.f32 %v3848_v2, %v2381_v21  ;;  %v2383_v47 = vpop.xlane.xlu1 %2382  ;;  %vm2478_vm4 = vweird.f32 %v3848_v2 }
 0x417   : > { %v2471_v51 = vsel %vm2468_vm3, %v2470_v4, %v2466_v40  ;;  %3849 = vrcp.f32 %v2383_v47  ;;  %vm2479_vm6 = vmor %vm2477_vm5, %vm2478_vm4  ;;  %v2497_v22 = vand.u32 2147483648, %v2383_v47  ;;  %v2495_v46 = vand.u32 2147483647, %v2383_v47 }
 0x418   : > { %v2630_v16 = vmul.f32 %v4837_v55, %v2471_v51  ;;  %v2474_v59 = vsub.f32 1.0, %v2473_v33  ;;  %vm2491_vm9 = vweird.f32 %v2383_v47 }
 0x419   : > { %v2498_v29 = vor.u32 1.1754944e-38, %v2497_v22  ;;  %vm2496_vm11 = vcmp.eq.f32.partialorder %v2495_v46, 8.507059e+37 }
 0x41a   : > { %2646 = vst [vmem:[%s4885_s17 + $0x20] sm:$0xff] %v2630_v16  ;;  %v2475_v49 = vmul.f32 %v3848_v2, %v2474_v59 }
 0x41c   : > { %v2476_v11 = vadd.f32 %v3848_v2, %v2475_v49 }
 0x41d   : > { %v3850_v60 = vpop.eup %3849 }
 0x41e   : > { %v2480_v53 = vsel %vm2479_vm6, %v3848_v2, %v2476_v11  ;;  %v2487_v45 = vmul.f32 %v3850_v60, %v2383_v47  ;;  %v2385_v6 = vpop.xlane.xlu2 %2384  ;;  %vm2492_vm8 = vweird.f32 %v3850_v60 }
 0x41f   : > { %v2485_v41 = vsel %vm2482_vm7, %v2484_v20, %v2480_v53  ;;  %3851 = vrcp.f32 %v2385_v6  ;;  %vm2493_vm10 = vmor %vm2491_vm9, %vm2492_vm8  ;;  %v2511_v7 = vand.u32 2147483648, %v2385_v6  ;;  %v2509_v0 = vand.u32 2147483647, %v2385_v6 }
 0x420   : > { %v2631_v55 = vmul.f32 %v4841_v56, %v2485_v41  ;;  %v2488_v8 = vsub.f32 1.0, %v2487_v45  ;;  %vm2505_vm13 = vweird.f32 %v2385_v6 }
 0x421   : > { %v2512_v37 = vor.u32 1.1754944e-38, %v2511_v7  ;;  %vm2510_vm15 = vcmp.eq.f32.partialorder %v2509_v0, 8.507059e+37 }
 0x422   : > { %2647 = vst [vmem:[%s4885_s17 + $0x28] sm:$0xff] %v2631_v55  ;;  %v2489_v3 = vmul.f32 %v3850_v60, %v2488_v8 }
 0x424   : > { %v2490_v27 = vadd.f32 %v3850_v60, %v2489_v3 }
 0x425   : > { %v3852_v24 = vpop.eup %3851 }
 0x426   : > { %v2494_v31 = vsel %vm2493_vm10, %v3850_v60, %v2490_v27  ;;  %v2501_v36 = vmul.f32 %v3852_v24, %v2385_v6  ;;  %v2387_v61 = vpop.xlane.xlu0 %2386  ;;  %vm2506_vm12 = vweird.f32 %v3852_v24 }
 0x427   : > { %v2499_v23 = vsel %vm2496_vm11, %v2498_v29, %v2494_v31  ;;  %3853 = vrcp.f32 %v2387_v61  ;;  %vm2507_vm14 = vmor %vm2505_vm13, %vm2506_vm12  ;;  %v2525_v19 = vand.u32 2147483648, %v2387_v61  ;;  %v2523_v34 = vand.u32 2147483647, %v2387_v61 }
 0x428   : > { %v2632_v56 = vmul.f32 %v4845_v38, %v2499_v23  ;;  %v2502_v43 = vsub.f32 1.0, %v2501_v36  ;;  %vm2519_vm1 = vweird.f32 %v2387_v61 }
 0x429   : > { %v2526_v39 = vor.u32 1.1754944e-38, %v2525_v19  ;;  %vm2524_vm3 = vcmp.eq.f32.partialorder %v2523_v34, 8.507059e+37 }
 0x42a   : > { %2648 = vst [vmem:[%s4885_s17 + $0x30] sm:$0xff] %v2632_v56  ;;  %v2503_v58 = vmul.f32 %v3852_v24, %v2502_v43 }
 0x42c   : > { %v2504_v12 = vadd.f32 %v3852_v24, %v2503_v58 }
 0x42d   : > { %v3854_v52 = vpop.eup %3853 }
 0x42e   : > { %v2508_v32 = vsel %vm2507_vm14, %v3852_v24, %v2504_v12  ;;  %v2515_v35 = vmul.f32 %v3854_v52, %v2387_v61  ;;  %v2389_v5 = vpop.xlane.xlu1 %2388  ;;  %vm2520_vm0 = vweird.f32 %v3854_v52 }
 0x42f   : > { %v2513_v15 = vsel %vm2510_vm15, %v2512_v37, %v2508_v32  ;;  %3855 = vrcp.f32 %v2389_v5  ;;  %vm2521_vm2 = vmor %vm2519_vm1, %vm2520_vm0  ;;  %v2539_v2 = vand.u32 2147483648, %v2389_v5  ;;  %v2537_v40 = vand.u32 2147483647, %v2389_v5 }
 0x430   : > { %v2633_v38 = vmul.f32 %v4849_v10, %v2513_v15  ;;  %v2516_v25 = vsub.f32 1.0, %v2515_v35  ;;  %vm2533_vm5 = vweird.f32 %v2389_v5 }
 0x431   : > { %v2540_v51 = vor.u32 1.1754944e-38, %v2539_v2  ;;  %vm2538_vm7 = vcmp.eq.f32.partialorder %v2537_v40, 8.507059e+37 }
 0x432   : > { %2649 = vst [vmem:[%s4885_s17 + $0x38] sm:$0xff] %v2633_v38  ;;  %v2517_v48 = vmul.f32 %v3854_v52, %v2516_v25 }
 0x434   : > { %v2518_v21 = vadd.f32 %v3854_v52, %v2517_v48 }
 0x435   : > { %v3856_v26 = vpop.eup %3855 }
 0x436   : > { %v2522_v63 = vsel %vm2521_vm2, %v3854_v52, %v2518_v21  ;;  %v2529_v42 = vmul.f32 %v3856_v26, %v2389_v5  ;;  %v2391_v44 = vpop.xlane.xlu2 %2390  ;;  %vm2534_vm4 = vweird.f32 %v3856_v26 }
 0x437   : > { %v2527_v9 = vsel %vm2524_vm3, %v2526_v39, %v2522_v63  ;;  %3857 = vrcp.f32 %v2391_v44  ;;  %vm2535_vm6 = vmor %vm2533_vm5, %vm2534_vm4  ;;  %v2553_v11 = vand.u32 2147483648, %v2391_v44  ;;  %v2551_v20 = vand.u32 2147483647, %v2391_v44 }
 0x438   : > { %v2634_v10 = vmul.f32 %v4853_v1, %v2527_v9  ;;  %v2530_v54 = vsub.f32 1.0, %v2529_v42  ;;  %vm2547_vm9 = vweird.f32 %v2391_v44 }
 0x439   : > { %v2554_v6 = vor.u32 1.1754944e-38, %v2553_v11  ;;  %vm2552_vm11 = vcmp.eq.f32.partialorder %v2551_v20, 8.507059e+37 }
 0x43a   : > { %2650 = vst [vmem:[%s4885_s17 + $0x40] sm:$0xff] %v2634_v10  ;;  %v2531_v4 = vmul.f32 %v3856_v26, %v2530_v54 }
 0x43c   : > { %v2532_v33 = vadd.f32 %v3856_v26, %v2531_v4 }
 0x43d   : > { %v3858_v47 = vpop.eup %3857 }
 0x43e   : > { %v2536_v16 = vsel %vm2535_vm6, %v3856_v26, %v2532_v33  ;;  %v2543_v59 = vmul.f32 %v3858_v47, %v2391_v44  ;;  %v2393_v18 = vpop.xlane.xlu0 %2392  ;;  %vm2548_vm8 = vweird.f32 %v3858_v47 }
 0x43f   : > { %v2541_v49 = vsel %vm2538_vm7, %v2540_v51, %v2536_v16  ;;  %3859 = vrcp.f32 %v2393_v18  ;;  %vm2549_vm10 = vmor %vm2547_vm9, %vm2548_vm8  ;;  %v2567_v46 = vand.u32 2147483648, %v2393_v18  ;;  %v2565_v24 = vand.u32 2147483647, %v2393_v18 }
 0x440   : > { %v2635_v1 = vmul.f32 %v4857_v13, %v2541_v49  ;;  %v2544_v50 = vsub.f32 1.0, %v2543_v59  ;;  %vm2561_vm13 = vweird.f32 %v2393_v18 }
 0x441   : > { %v2568_v36 = vor.u32 1.1754944e-38, %v2567_v46  ;;  %vm2566_vm15 = vcmp.eq.f32.partialorder %v2565_v24, 8.507059e+37 }
 0x442   : > { %2651 = vst [vmem:[%s4885_s17 + $0x48] sm:$0xff] %v2635_v1  ;;  %v2545_v60 = vmul.f32 %v3858_v47, %v2544_v50 }
 0x444   : > { %v2546_v53 = vadd.f32 %v3858_v47, %v2545_v60 }
 0x445   : > { %v3860_v45 = vpop.eup %3859 }
 0x446   : > { %v2550_v41 = vsel %vm2549_vm10, %v3858_v47, %v2546_v53  ;;  %v2557_v55 = vmul.f32 %v3860_v45, %v2393_v18  ;;  %v2395_v8 = vpop.xlane.xlu1 %2394  ;;  %vm2562_vm12 = vweird.f32 %v3860_v45 }
 0x447   : > { %v2555_v22 = vsel %vm2552_vm11, %v2554_v6, %v2550_v41  ;;  %3861 = vrcp.f32 %v2395_v8  ;;  %vm2563_vm14 = vmor %vm2561_vm13, %vm2562_vm12  ;;  %v2581_v58 = vand.u32 2147483648, %v2395_v8  ;;  %v2579_v12 = vand.u32 2147483647, %v2395_v8 }
 0x448   : > { %v2636_v13 = vmul.f32 %v4861_v62, %v2555_v22  ;;  %v2558_v3 = vsub.f32 1.0, %v2557_v55  ;;  %vm2575_vm1 = vweird.f32 %v2395_v8 }
 0x449   : > { %v2582_v32 = vor.u32 1.1754944e-38, %v2581_v58  ;;  %vm2580_vm3 = vcmp.eq.f32.partialorder %v2579_v12, 8.507059e+37 }
 0x44a   : > { %2652 = vst [vmem:[%s4885_s17 + $0x50] sm:$0xff] %v2636_v13  ;;  %v2559_v27 = vmul.f32 %v3860_v45, %v2558_v3 }
 0x44c   : > { %v2560_v29 = vadd.f32 %v3860_v45, %v2559_v27 }
 0x44d   : > { %v3862_v31 = vpop.eup %3861 }
 0x44e   : > { %v2564_v61 = vsel %vm2563_vm14, %v3860_v45, %v2560_v29  ;;  %v2571_v23 = vmul.f32 %v3862_v31, %v2395_v8  ;;  %v2397_v56 = vpop.xlane.xlu2 %2396  ;;  %vm2576_vm0 = vweird.f32 %v3862_v31 }
 0x44f   : > { %v2569_v43 = vsel %vm2566_vm15, %v2568_v36, %v2564_v61  ;;  %3863 = vrcp.f32 %v2397_v56  ;;  %vm2577_vm2 = vmor %vm2575_vm1, %vm2576_vm0  ;;  %v2595_v19 = vand.u32 2147483648, %v2397_v56  ;;  %v2593_v34 = vand.u32 2147483647, %v2397_v56 }
 0x450   : > { %v2637_v62 = vmul.f32 %v4865_v28, %v2569_v43  ;;  %v2572_v7 = vsub.f32 1.0, %v2571_v23  ;;  %vm2589_vm5 = vweird.f32 %v2397_v56 }
 0x451   : > { %v2596_v39 = vor.u32 1.1754944e-38, %v2595_v19  ;;  %vm2594_vm7 = vcmp.eq.f32.partialorder %v2593_v34, 8.507059e+37 }
 0x452   : > { %2653 = vst [vmem:[%s4885_s17 + $0x58] sm:$0xff] %v2637_v62  ;;  %v2573_v0 = vmul.f32 %v3862_v31, %v2572_v7 }
 0x454   : > { %v2574_v52 = vadd.f32 %v3862_v31, %v2573_v0 }
 0x455   : > { %v3864_v37 = vpop.eup %3863 }
 0x456   : > { %v2578_v35 = vsel %vm2577_vm2, %v3862_v31, %v2574_v52  ;;  %v2585_v5 = vmul.f32 %v3864_v37, %v2397_v56  ;;  %v2399_v15 = vpop.xlane.xlu0 %2398  ;;  %vm2590_vm4 = vweird.f32 %v3864_v37 }
 0x457   : > { %v2583_v38 = vsel %vm2580_vm3, %v2582_v32, %v2578_v35  ;;  %3865 = vrcp.f32 %v2399_v15  ;;  %vm2591_vm6 = vmor %vm2589_vm5, %vm2590_vm4  ;;  %v2609_v54 = vand.u32 2147483648, %v2399_v15  ;;  %v2607_v4 = vand.u32 2147483647, %v2399_v15 }
 0x458   : > { %v2638_v28 = vmul.f32 %v4869_v14, %v2583_v38  ;;  %v2586_v25 = vsub.f32 1.0, %v2585_v5  ;;  %vm2603_vm9 = vweird.f32 %v2399_v15 }
 0x459   : > { %v2610_v47 = vor.u32 1.1754944e-38, %v2609_v54  ;;  %vm2608_vm11 = vcmp.eq.f32.partialorder %v2607_v4, 8.507059e+37 }
 0x45a   : > { %2654 = vst [vmem:[%s4885_s17 + $0x60] sm:$0xff] %v2638_v28  ;;  %v2587_v48 = vmul.f32 %v3864_v37, %v2586_v25 }
 0x45c   : > { %v2588_v21 = vadd.f32 %v3864_v37, %v2587_v48 }
 0x45d   : > { %v3866_v26 = vpop.eup %3865 }
 0x45e   : > { %v2592_v63 = vsel %vm2591_vm6, %v3864_v37, %v2588_v21  ;;  %v2599_v42 = vmul.f32 %v3866_v26, %v2399_v15  ;;  %v2401_v44 = vpop.xlane.xlu1 %2400  ;;  %vm2604_vm8 = vweird.f32 %v3866_v26 }
 0x45f   : > { %v2597_v9 = vsel %vm2594_vm7, %v2596_v39, %v2592_v63  ;;  %3867 = vrcp.f32 %v2401_v44  ;;  %vm2605_vm10 = vmor %vm2603_vm9, %vm2604_vm8  ;;  %v2623_v49 = vand.u32 2147483648, %v2401_v44  ;;  %v2621_v50 = vand.u32 2147483647, %v2401_v44 }
 0x460   : > { %v2639_v14 = vmul.f32 %v4873_v57, %v2597_v9  ;;  %v2600_v10 = vsub.f32 1.0, %v2599_v42  ;;  %vm2617_vm13 = vweird.f32 %v2401_v44 }
 0x461   : > { %v2624_v60 = vor.u32 1.1754944e-38, %v2623_v49  ;;  %vm2622_vm15 = vcmp.eq.f32.partialorder %v2621_v50, 8.507059e+37 }
 0x462   : > { %2655 = vst [vmem:[%s4885_s17 + $0x68] sm:$0xff] %v2639_v14  ;;  %v2601_v2 = vmul.f32 %v3866_v26, %v2600_v10 }
 0x464   : > { %v2602_v40 = vadd.f32 %v3866_v26, %v2601_v2 }
 0x465   : > { %v3868_v33 = vpop.eup %3867 }
 0x466   : > { %v2606_v51 = vsel %vm2605_vm10, %v3866_v26, %v2602_v40  ;;  %v2613_v16 = vmul.f32 %v3868_v33, %v2401_v44  ;;  %vm2618_vm12 = vweird.f32 %v3868_v33 }
 0x467   : > { %v2611_v59 = vsel %vm2608_vm11, %v2610_v47, %v2606_v51  ;;  %vm2619_vm14 = vmor %vm2617_vm13, %vm2618_vm12 }
 0x468   : > { %v2640_v57 = vmul.f32 %v4877_v30, %v2611_v59  ;;  %v2614_v18 = vsub.f32 1.0, %v2613_v16 }
 0x46a   : > { %2656 = vst [vmem:[%s4885_s17 + $0x70] sm:$0xff] %v2640_v57  ;;  %v2615_v1 = vmul.f32 %v3868_v33, %v2614_v18 }
 0x46c   : > { %v2616_v11 = vadd.f32 %v3868_v33, %v2615_v1 }
 0x46e   : > { %v2620_v30 = vsel %vm2619_vm14, %v3868_v33, %v2616_v11 }
 0x46f   : > { %v2625_v20 = vsel %vm2622_vm15, %v2624_v60, %v2620_v30 }
 0x470   : > { %v2641_v53 = vmul.f32 %v4880_v17, %v2625_v20 }
 0x472   : > { %2657 = vst [vmem:[%s4885_s17 + $0x78] sm:$0xff] %v2641_v53 }
 0x473   : > { %4017 = shalt.err (!%p4014_p10)
}
 0x474   : > { %s4075_s15 = smov 128   ;;  %s4076_s29 = smov 8  }
 0x475   : > { %3733 = dma.vmem_to_hbm [thread:$0]  (%p4190_p7), %s2672_s7, 2048, %s2674_s22, %s2659_s13, %s4075_s15, %s4075_s15, %s4076_s29  }
 0x476 PF: > { %s2688_s16 = sand.u32 1, %s4052_s18   ;;  %p5020_p12 = scmp.ge.s32.totalorder %s4064_s21, 2 }
 0x477   : > { %s2689_s17 = scalar_lea.sflag [#allocation4], %s2688_s16 }
 0x478   : > { %p3750_p13 = pnand %p5020_p12, %p4142_p6 }
 0x47a   : > { %p3751_p0 = pneg %p3750_p13 }
 0x47c   : > { %4047 = dma.done.wait (%p3751_p0), %s2689_s17, 2048  }
 0x47d   : > { %4049 = vsyncadd (%p3751_p0), %s2689_s17, 4294965248  ;;  %p20_p3 = scmp.ge.s32.totalorder %s4176_s30, 4   ;;  %s5021_s18 = smov %s4056_s19 }
 0x47e   : > { %s5022_s19 = smov %s4060_s20  ;;  %s5023_s20 = smov %s4186_s9 }
 0x47f   : > { %s5024_s21 = smov %s4176_s30  ;;  %22 = sbr.rel (!%p20_p3) target bundleno = 9 (0x9), region = 97 }
 0x484   :  { %2695 = vsyncpa [#allocation3], 1 }
 0x485   :  { %2697 = vsyncpa [#allocation3 + $0x1], 1 }
 0x486   :  { %2698 = vsyncpa [#allocation6], 1 }
 0x487   :  { %2699 = vsyncpa [#allocation9], 1 }
 0x488   :  { %2700 = vsyncpa [#allocation4], 1 }
 0x489   :  { %2702 = vsyncpa [#allocation4 + $0x1], 1 }

</bundles_post_ra>
